<compile_context>
chip_gen: v7x
topology: tpu7x:2x2x1
jax: 0.10.0
libtpu: 0.0.40
codegen_flags: <defaults>
</compile_context>

<pallas_src>
import functools

import jax
import jax.numpy as jnp
import numpy as np
from jax import lax
from jax.experimental import pallas as pl
from jax.experimental.pallas import tpu as pltpu


def _round_up(x, m):
    return (x + m - 1) // m * m


def _gelu_tanh(x):
    c = 0.7978845608028654  # sqrt(2/pi)
    return 0.5 * x * (1.0 + jnp.tanh(c * (x + 0.044715 * (x * x * x))))


def _convnext_kernel(dilation, T, C_real, I_real, tile_t, n_tiles, halo,
                     x_hbm, dww_ref, dwb_ref, lnw_ref, lnb_ref,
                     w1_ref, b1_ref, gamma_ref, beta_ref, w2_ref, b2_ref,
                     o_ref,
                     xe_ref, h_ref, gsq_ref, nx_ref, dma_sem):
    b = pl.program_id(0)
    p = pl.program_id(1)          # phase: 0 = stats pass, 1 = output pass
    t = pl.program_id(2)          # T-tile index
    pad = 3 * dilation
    c_pad = xe_ref.shape[1]
    xe_len = xe_ref.shape[0]
    s = pl.multiple_of(t * tile_t, tile_t)

    # NOTE: the scratch carries (xe / h / gsq / nx) rely on the grid iterating
    # batch-major with (phase, tile) inner and only the batch axis parallel.
    @pl.when((p == 0) & (t == 0))
    def _init():
        # DMA this batch's input straight from HBM into the halo'd scratch; only
        # the halo rows are zeroed (the DMA target region is written exactly).
        cp = pltpu.make_async_copy(x_hbm.at[b], xe_ref.at[pl.ds(halo, T), :], dma_sem)
        cp.start()
        gsq_ref[...] = jnp.zeros_like(gsq_ref)
        cp.wait()
        xe_ref[0:halo, :] = jnp.zeros((halo, c_pad), xe_ref.dtype)
        xe_ref[halo + T:xe_len, :] = jnp.zeros((xe_len - halo - T, c_pad), xe_ref.dtype)

    @pl.when(p == 0)
    def _phase0():
        # Depthwise Conv1d(kernel=7, groups=C, dilation): read each tap directly
        # from the halo'd scratch and fuse the multiply-add (acc init = tap 0).
        def tap(k):
            return xe_ref[pl.ds(s + (halo - pad + k * dilation), tile_t), :]

        y = tap(0) * dww_ref[0:1, :]
        for k in range(1, 7):
            y = y + tap(k) * dww_ref[k:k + 1, :]
        y = y + dwb_ref[...]

        # LayerNorm over the REAL C channels (two-pass variance).  Padded lanes
        # of y are exactly zero; they are masked out of the variance sum only
        # when C is actually padded.
        inv_c = 1.0 / C_real
        mu = jnp.sum(y, axis=-1, keepdims=True) * inv_c
        d = y - mu
        if C_real != c_pad:
            lane = lax.broadcasted_iota(jnp.int32, d.shape, 1)
            dv = jnp.where(lane < C_real, d, 0.0)
        else:
            dv = d
        var = jnp.sum(dv * dv, axis=-1, keepdims=True) * inv_c
        yln = d * lax.rsqrt(var + 1e-6) * lnw_ref[...] + lnb_ref[...]

        # pwconv1 (bf16 MXU, f32 acc) + tanh-GELU, computed ONCE.  Cache h for
        # phase 1 (bf16) and accumulate the GRN sum(h^2) statistic (f32).
        h = jnp.dot(yln.astype(jnp.bfloat16), w1_ref[...],
                    preferred_element_type=jnp.float32) + b1_ref[...]
        h = _gelu_tanh(h)
        if n_tiles * tile_t != T:                       # mask rows past T
            row = lax.broadcasted_iota(jnp.int32, h.shape, 0) + s
            h = jnp.where(row < T, h, 0.0)
        h_ref[pl.ds(s, tile_t), :] = h.astype(jnp.bfloat16)
        gsq_ref[...] += jnp.sum(h * h, axis=0, keepdims=True)

    @pl.when((p == 1) & (t == 0))
    def _grn_scale():
        # Full-sequence GRN scale, computed once per batch (padded I lanes are 0,
        # so the lane sum divided by I_real gives the true mean).
        gx = jnp.sqrt(gsq_ref[...])
        gmean = jnp.sum(gx, axis=-1, keepdims=True) * (1.0 / I_real)
        nx_ref[...] = gx / (gmean + 1e-6)

    @pl.when(p == 1)
    def _phase1():
        h = h_ref[pl.ds(s, tile_t), :].astype(jnp.float32)
        g = gamma_ref[...] * (h * nx_ref[...]) + beta_ref[...] + h

        # pwconv2 (bf16 MXU, f32 acc) + residual from the exact copy of x.
        out = jnp.dot(g.astype(jnp.bfloat16), w2_ref[...],
                      preferred_element_type=jnp.float32) + b2_ref[...]
        residual = xe_ref[pl.ds(pl.multiple_of(s + halo, 8), tile_t), :]
        o_ref[0, :, :] = (residual + out).astype(o_ref.dtype)


def convnext_v2_block(x, params, dilation=1, tile_t=None):
    B, T, C = x.shape
    I = params["pw1_w"].shape[1]
    C_pad = _round_up(C, 128)
    I_pad = _round_up(I, 128)

    try:
        vmem_cap = int(pltpu.get_tpu_info().vmem_capacity_bytes)
    except Exception:
        vmem_cap = 64 * 2 ** 20            # conservative (v7x per-TensorCore)

    if tile_t is None:
        # Generation-aware tile: 512 where VMEM allows (v5e/v6e 128 MiB), 256 on
        # v7x's 64 MiB.
        tile_t = 512 if vmem_cap > 96 * 2 ** 20 else 256
        tile_t = min(tile_t, _round_up(T, 16))
    assert tile_t % 16 == 0, "tile_t must be a multiple of 16 (bf16 sublane packing)"
    n_tiles = -(-T // tile_t)
    T_up = n_tiles * tile_t
    halo = _round_up(3 * dilation, 8)
    xe_len = T_up + 2 * halo

    # Lane-pad activations/params to multiples of 128 (no-op when C, I already
    # are, as in real F5-TTS configs).  Weight matrices pre-cast to bf16.
    def pad_last(a, n):
        if a.shape[-1] == n:
            return a
        return jnp.pad(a, [(0, 0)] * (a.ndim - 1) + [(0, n - a.shape[-1])])

    xin = pad_last(x, C_pad).astype(jnp.float32)
    dw_w = pad_last(params["dw_w"], C_pad)
    dw_b = pad_last(params["dw_b"], C_pad)
    ln_w = pad_last(params["ln_w"], C_pad)
    ln_b = pad_last(params["ln_b"], C_pad)
    w1 = jnp.pad(params["pw1_w"], ((0, C_pad - C), (0, I_pad - I))).astype(jnp.bfloat16)
    b1 = pad_last(params["pw1_b"], I_pad)
    gamma = pad_last(params["grn_gamma"], I_pad)
    beta = pad_last(params["grn_beta"], I_pad)
    w2 = jnp.pad(params["pw2_w"], ((0, I_pad - I), (0, C_pad - C))).astype(jnp.bfloat16)
    b2 = pad_last(params["pw2_b"], C_pad)

    kernel = functools.partial(_convnext_kernel, dilation, T, C, I,
                               tile_t, n_tiles, halo)

    scratch_shapes = [
        pltpu.VMEM((xe_len, C_pad), jnp.float32),    # halo'd copy of x (taps + residual)
        pltpu.VMEM((T_up, I_pad), jnp.bfloat16),     # cached h = GELU(pwconv1(LN(conv)))
        pltpu.VMEM((1, I_pad), jnp.float32),         # GRN sum(h^2) accumulator
        pltpu.VMEM((1, I_pad), jnp.float32),         # GRN per-batch scale Nx
        pltpu.SemaphoreType.DMA(()),                 # x HBM->VMEM DMA semaphore
    ]

    flops = int(B * (2 * 2 * T_up * C_pad * I_pad + 2 * 7 * T_up * C_pad))
    bytes_accessed = int(B * T * C_pad * 4 + B * T_up * C_pad * 4
                         + 2 * C_pad * I_pad * 2 + 16 * (C_pad + I_pad) * 4)
    cost = pl.CostEstimate(flops=flops,
                           transcendentals=int(B * T_up * I_pad),
                           bytes_accessed=bytes_accessed)

    vmem_est = (xe_len * C_pad * 4                       # xe scratch
                + T_up * I_pad * 2                       # h cache
                + 2 * I_pad * 4                          # gsq + nx
                + 2 * tile_t * C_pad * 4                 # output block (double-buffered)
                + 2 * 2 * C_pad * I_pad * 2              # w1 + w2 (worst case double-buffered)
                + 6 * tile_t * max(C_pad, I_pad) * 4     # per-tile f32 temps
                + 512 * 1024)                            # small params + slack
    vmem_limit = int(min(max(32 * 2 ** 20, 2 * vmem_est), int(vmem_cap * 0.85)))

    def build(single_buffer_weights):
        def pspec(shape):
            kw = {}
            if single_buffer_weights:
                kw["pipeline_mode"] = pl.Buffered(1)     # constant index map: no 2nd buffer
            return pl.BlockSpec(shape, lambda b, p, t: (0,) * len(shape), **kw)

        grid_spec = pltpu.PrefetchScalarGridSpec(
            num_scalar_prefetch=0,
            grid=(B, 2, n_tiles),
            in_specs=[
                pl.BlockSpec(memory_space=pl.ANY),   # x stays in HBM; kernel DMAs it once/batch
                pspec((7, C_pad)),        # depthwise conv weight (taps, channels)
                pspec((1, C_pad)),        # depthwise conv bias
                pspec((1, C_pad)),        # LayerNorm weight
                pspec((1, C_pad)),        # LayerNorm bias
                pspec((C_pad, I_pad)),    # pwconv1 weight (bf16, transposed vs torch)
                pspec((1, I_pad)),        # pwconv1 bias
                pspec((1, I_pad)),        # GRN gamma
                pspec((1, I_pad)),        # GRN beta
                pspec((I_pad, C_pad)),    # pwconv2 weight (bf16, transposed vs torch)
                pspec((1, C_pad)),        # pwconv2 bias
            ],
            # Phase 0 keeps block (b, 0) resident and never writes it; the first
            # real write happens at phase 1 / tile 0 before the block index
            # changes, so no garbage is ever written back to HBM.
            out_specs=pl.BlockSpec((1, tile_t, C_pad), lambda b, p, t: (b, p * t, 0)),
            scratch_shapes=scratch_shapes,
        )
        return pl.pallas_call(
            kernel,
            out_shape=jax.ShapeDtypeStruct((B, T_up, C_pad), x.dtype),
            grid_spec=grid_spec,
            compiler_params=pltpu.CompilerParams(
                dimension_semantics=("parallel", "arbitrary", "arbitrary"),
                vmem_limit_bytes=vmem_limit),
            cost_estimate=cost,
        )

    args = (xin, dw_w, dw_b, ln_w, ln_b, w1, b1, gamma, beta, w2, b2)
    try:
        out = build(True)(*args)
    except Exception:
        # pipeline_mode=pl.Buffered(1) unsupported on this jax build: fall back
        # to default double-buffered weight blocks (same semantics).
        out = build(False)(*args)
    return out[:, :T, :C]


def convnext_v2_block_reference(x, params, dilation=1):
    # Pure-JAX f32 reference mirroring the PyTorch forward (exact erf GELU).
    pad = 3 * dilation
    T = x.shape[1]
    x_pad = jnp.pad(x, ((0, 0), (pad, pad), (0, 0)))
    y = sum(x_pad[:, k * dilation:k * dilation + T, :] * params["dw_w"][k][None, None, :]
            for k in range(7)) + params["dw_b"][0]
    mu = jnp.mean(y, -1, keepdims=True)
    var = jnp.mean((y - mu) ** 2, -1, keepdims=True)
    y = (y - mu) / jnp.sqrt(var + 1e-6) * params["ln_w"][0] + params["ln_b"][0]
    h = y @ params["pw1_w"] + params["pw1_b"][0]
    h = jax.nn.gelu(h, approximate=False)
    gx = jnp.sqrt(jnp.sum(h * h, axis=1, keepdims=True))
    nx = gx / (jnp.mean(gx, -1, keepdims=True) + 1e-6)
    h = params["grn_gamma"][0] * (h * nx) + params["grn_beta"][0] + h
    out = h @ params["pw2_w"] + params["pw2_b"][0]
    return x + out


def make_params(key, dim, intermediate_dim):
    ks = jax.random.split(key, 11)
    f32 = jnp.float32
    # nn.Conv1d(dim, dim, 7, groups=dim) weight shape (dim, 1, 7) -> stored (7, dim)
    dw_w_torch = 0.2 * jax.random.normal(ks[0], (dim, 1, 7), f32)
    params = {
        "dw_w": jnp.transpose(dw_w_torch[:, 0, :], (1, 0)),
        "dw_b": 0.1 * jax.random.normal(ks[1], (1, dim), f32),
        "ln_w": 1.0 + 0.1 * jax.random.normal(ks[2], (1, dim), f32),
        "ln_b": 0.1 * jax.random.normal(ks[3], (1, dim), f32),
        # nn.Linear weights stored transposed: (in, out)
        "pw1_w": jax.random.normal(ks[4], (dim, intermediate_dim), f32) / jnp.sqrt(dim),
        "pw1_b": 0.1 * jax.random.normal(ks[5], (1, intermediate_dim), f32),
        # GRN params are zeros in __init__; nonzero here to exercise the path
        "grn_gamma": 0.1 * jax.random.normal(ks[6], (1, intermediate_dim), f32),
        "grn_beta": 0.1 * jax.random.normal(ks[7], (1, intermediate_dim), f32),
        "pw2_w": jax.random.normal(ks[8], (intermediate_dim, dim), f32) / jnp.sqrt(intermediate_dim),
        "pw2_b": 0.1 * jax.random.normal(ks[9], (1, dim), f32),
    }
    return params, ks[10]


if __name__ == "__main__":
    key = jax.random.PRNGKey(0)
    dim, intermediate_dim = 32, 64
    params, xkey = make_params(key, dim, intermediate_dim)

    # bf16 MXU operands + tanh-GELU vs the f32 exact-erf reference -> 3e-2 budget.
    TOL = 3e-2

    # Case 1: dilation=1, T divisible by the T-tile (3 tiles, two-phase GRN).
    B, T = 2, 48
    x = jax.random.normal(xkey, (B, T, dim), jnp.float32)
    out = jax.block_until_ready(convnext_v2_block(x, params, dilation=1, tile_t=16))
    ref = jax.block_until_ready(convnext_v2_block_reference(x, params, dilation=1))
    assert out.shape == (B, T, dim) and out.dtype == jnp.float32
    assert np.allclose(np.asarray(out), np.asarray(ref), rtol=TOL, atol=TOL)

    # Case 2: dilation=2 with a partial last T-tile (exercises halo + row masking).
    B2, T2 = 2, 40
    x2 = jax.random.normal(jax.random.PRNGKey(1), (B2, T2, dim), jnp.float32)
    out2 = jax.block_until_ready(convnext_v2_block(x2, params, dilation=2, tile_t=16))
    ref2 = jax.block_until_ready(convnext_v2_block_reference(x2, params, dilation=2))
    assert out2.shape == (B2, T2, dim)
    assert np.allclose(np.asarray(out2), np.asarray(ref2), rtol=TOL, atol=TOL)

    print("KERNEL_OK")
</pallas_src>

<mosaic_0001>
module attributes {stable_mosaic.version = 11 : i64} {
  func.func @_convnext_kernel(%arg0: i32, %arg1: i32, %arg2: i32, %arg3: memref<2x48x128xf32, #tpu.memory_space<any>>, %arg4: memref<7x128xf32, #tpu.memory_space<vmem>>, %arg5: memref<1x128xf32, #tpu.memory_space<vmem>>, %arg6: memref<1x128xf32, #tpu.memory_space<vmem>>, %arg7: memref<1x128xf32, #tpu.memory_space<vmem>>, %arg8: memref<128x128xbf16, #tpu.memory_space<vmem>>, %arg9: memref<1x128xf32, #tpu.memory_space<vmem>>, %arg10: memref<1x128xf32, #tpu.memory_space<vmem>>, %arg11: memref<1x128xf32, #tpu.memory_space<vmem>>, %arg12: memref<128x128xbf16, #tpu.memory_space<vmem>>, %arg13: memref<1x128xf32, #tpu.memory_space<vmem>>, %arg14: memref<1x16x128xf32, #tpu.memory_space<vmem>>, %arg15: memref<64x128xf32, #tpu.memory_space<vmem>>, %arg16: memref<48x128xbf16, #tpu.memory_space<vmem>>, %arg17: memref<1x128xf32, #tpu.memory_space<vmem>>, %arg18: memref<1x128xf32, #tpu.memory_space<vmem>>, %arg19: memref<!tpu.dma_semaphore, #tpu.memory_space<semaphore_mem>>) attributes {dimension_semantics = [#tpu.dimension_semantics<parallel>, #tpu.dimension_semantics<arbitrary>, #tpu.dimension_semantics<arbitrary>], iteration_bounds = array<i64: 2, 2, 3>, scalar_prefetch = 0 : i64, scratch_operands = 5 : i64, tpu.core_type = #tpu.core_type<tc>, window_params = [{}, {pipeline_mode = #tpu.pipeline_mode<synchronous>, transform_indices = @transform_1, window_bounds = array<i64: 7, 128>}, {pipeline_mode = #tpu.pipeline_mode<synchronous>, transform_indices = @transform_2, window_bounds = array<i64: 1, 128>}, {pipeline_mode = #tpu.pipeline_mode<synchronous>, transform_indices = @transform_3, window_bounds = array<i64: 1, 128>}, {pipeline_mode = #tpu.pipeline_mode<synchronous>, transform_indices = @transform_4, window_bounds = array<i64: 1, 128>}, {pipeline_mode = #tpu.pipeline_mode<synchronous>, transform_indices = @transform_5, window_bounds = array<i64: 128, 128>}, {pipeline_mode = #tpu.pipeline_mode<synchronous>, transform_indices = @transform_6, window_bounds = array<i64: 1, 128>}, {pipeline_mode = #tpu.pipeline_mode<synchronous>, transform_indices = @transform_7, window_bounds = array<i64: 1, 128>}, {pipeline_mode = #tpu.pipeline_mode<synchronous>, transform_indices = @transform_8, window_bounds = array<i64: 1, 128>}, {pipeline_mode = #tpu.pipeline_mode<synchronous>, transform_indices = @transform_9, window_bounds = array<i64: 128, 128>}, {pipeline_mode = #tpu.pipeline_mode<synchronous>, transform_indices = @transform_10, window_bounds = array<i64: 1, 128>}, {transform_indices = @transform_11, window_bounds = array<i64: 1, 16, 128>}]} {
    %c16_i32 = arith.constant 16 : i32
    %0 = arith.muli %arg2, %c16_i32 : i32
    %1 = tpu.assume_multiple %0, 16 : i32
    %c0_i32 = arith.constant 0 : i32
    %2 = arith.cmpi eq, %arg1, %c0_i32 : i32
    %c0_i32_0 = arith.constant 0 : i32
    %3 = arith.cmpi eq, %arg2, %c0_i32_0 : i32
    %4 = arith.andi %2, %3 : i1
    %5 = arith.extui %4 : i1 to i32
    %c0_i32_1 = arith.constant 0 : i32
    %6 = arith.cmpi ne, %5, %c0_i32_1 : i32
    scf.if %6 {
      %c0_i32_8 = arith.constant 0 : i32
      %c0_i32_9 = arith.constant 0 : i32
      %18 = tpu.memref_slice %arg3[%arg0, %c0_i32_8, %c0_i32_9] : memref<2x48x128xf32, #tpu.memory_space<any>> -> memref<1x48x128xf32, #tpu.memory_space<any>>
      %19 = tpu.memref_squeeze %18 : memref<1x48x128xf32, #tpu.memory_space<any>> -> memref<48x128xf32, #tpu.memory_space<any>>
      %c8_i32 = arith.constant 8 : i32
      %c0_i32_10 = arith.constant 0 : i32
      %20 = tpu.memref_slice %arg15[%c8_i32, %c0_i32_10] : memref<64x128xf32, #tpu.memory_space<vmem>> -> memref<48x128xf32, #tpu.memory_space<vmem>>
      tpu.enqueue_dma source(%19 : memref<48x128xf32, #tpu.memory_space<any>>) target(%20 : memref<48x128xf32, #tpu.memory_space<vmem>>) target_semaphore(%arg19 : memref<!tpu.dma_semaphore, #tpu.memory_space<semaphore_mem>>)
      %cst = arith.constant 0.000000e+00 : f32
      %21 = vector.broadcast %cst : f32 to vector<1x128xf32>
      %c0 = arith.constant 0 : index
      %c0_11 = arith.constant 0 : index
      %22 = vector.load %arg17[%c0, %c0_11] : memref<1x128xf32, #tpu.memory_space<vmem>>, vector<1x128xf32>
      tpu.vector_store %arg17[%c0, %c0_11], %21 {strides = array<i32>} : memref<1x128xf32, #tpu.memory_space<vmem>>, vector<1x128xf32>,
      %c0_i32_12 = arith.constant 0 : i32
      %c0_i32_13 = arith.constant 0 : i32
      %23 = tpu.memref_slice %arg3[%arg0, %c0_i32_12, %c0_i32_13] : memref<2x48x128xf32, #tpu.memory_space<any>> -> memref<1x48x128xf32, #tpu.memory_space<any>>
      %24 = tpu.memref_squeeze %23 : memref<1x48x128xf32, #tpu.memory_space<any>> -> memref<48x128xf32, #tpu.memory_space<any>>
      %c8_i32_14 = arith.constant 8 : i32
      %c0_i32_15 = arith.constant 0 : i32
      %25 = tpu.memref_slice %arg15[%c8_i32_14, %c0_i32_15] : memref<64x128xf32, #tpu.memory_space<vmem>> -> memref<48x128xf32, #tpu.memory_space<vmem>>
      tpu.wait_dma2 semaphore(%arg19 : memref<!tpu.dma_semaphore, #tpu.memory_space<semaphore_mem>>) src(%24 : memref<48x128xf32, #tpu.memory_space<any>>) dst(%25 : memref<48x128xf32, #tpu.memory_space<vmem>>)
      %cst_16 = arith.constant 0.000000e+00 : f32
      %26 = vector.broadcast %cst_16 : f32 to vector<8x128xf32>
      %c0_17 = arith.constant 0 : index
      %c0_18 = arith.constant 0 : index
      %27 = vector.load %arg15[%c0_17, %c0_18] : memref<64x128xf32, #tpu.memory_space<vmem>>, vector<8x128xf32>
      tpu.vector_store %arg15[%c0_17, %c0_18], %26 {strides = array<i32>} : memref<64x128xf32, #tpu.memory_space<vmem>>, vector<8x128xf32>,
      %cst_19 = arith.constant 0.000000e+00 : f32
      %28 = vector.broadcast %cst_19 : f32 to vector<8x128xf32>
      %c56 = arith.constant 56 : index
      %c0_20 = arith.constant 0 : index
      %29 = vector.load %arg15[%c56, %c0_20] : memref<64x128xf32, #tpu.memory_space<vmem>>, vector<8x128xf32>
      tpu.vector_store %arg15[%c56, %c0_20], %28 {strides = array<i32>} : memref<64x128xf32, #tpu.memory_space<vmem>>, vector<8x128xf32>,
    } else {
    }
    %c0_i32_2 = arith.constant 0 : i32
    %7 = arith.cmpi eq, %arg1, %c0_i32_2 : i32
    %8 = arith.extui %7 : i1 to i32
    %c0_i32_3 = arith.constant 0 : i32
    %9 = arith.cmpi ne, %8, %c0_i32_3 : i32
    scf.if %9 {
      %c5_i32 = arith.constant 5 : i32
      %18 = arith.addi %1, %c5_i32 : i32
      %19 = arith.index_cast %18 : i32 to index
      %c0 = arith.constant 0 : index
      %20 = vector.load %arg15[%19, %c0] : memref<64x128xf32, #tpu.memory_space<vmem>>, vector<16x128xf32>
      %c0_8 = arith.constant 0 : index
      %c0_9 = arith.constant 0 : index
      %21 = vector.load %arg4[%c0_8, %c0_9] : memref<7x128xf32, #tpu.memory_space<vmem>>, vector<1x128xf32>
      %22 = vector.broadcast %21 : vector<1x128xf32> to vector<16x128xf32>
      %23 = arith.mulf %20, %22 : vector<16x128xf32>
      %c6_i32 = arith.constant 6 : i32
      %24 = arith.addi %1, %c6_i32 : i32
      %25 = arith.index_cast %24 : i32 to index
      %c0_10 = arith.constant 0 : index
      %26 = vector.load %arg15[%25, %c0_10] : memref<64x128xf32, #tpu.memory_space<vmem>>, vector<16x128xf32>
      %c1 = arith.constant 1 : index
      %c0_11 = arith.constant 0 : index
      %27 = vector.load %arg4[%c1, %c0_11] : memref<7x128xf32, #tpu.memory_space<vmem>>, vector<1x128xf32>
      %28 = vector.broadcast %27 : vector<1x128xf32> to vector<16x128xf32>
      %29 = arith.mulf %26, %28 : vector<16x128xf32>
      %30 = arith.addf %23, %29 : vector<16x128xf32>
      %c7_i32 = arith.constant 7 : i32
      %31 = arith.addi %1, %c7_i32 : i32
      %32 = arith.index_cast %31 : i32 to index
      %c0_12 = arith.constant 0 : index
      %33 = vector.load %arg15[%32, %c0_12] : memref<64x128xf32, #tpu.memory_space<vmem>>, vector<16x128xf32>
      %c2 = arith.constant 2 : index
      %c0_13 = arith.constant 0 : index
      %34 = vector.load %arg4[%c2, %c0_13] : memref<7x128xf32, #tpu.memory_space<vmem>>, vector<1x128xf32>
      %35 = vector.broadcast %34 : vector<1x128xf32> to vector<16x128xf32>
      %36 = arith.mulf %33, %35 : vector<16x128xf32>
      %37 = arith.addf %30, %36 : vector<16x128xf32>
      %c8_i32 = arith.constant 8 : i32
      %38 = arith.addi %1, %c8_i32 : i32
      %39 = arith.index_cast %38 : i32 to index
      %c0_14 = arith.constant 0 : index
      %40 = vector.load %arg15[%39, %c0_14] : memref<64x128xf32, #tpu.memory_space<vmem>>, vector<16x128xf32>
      %c3 = arith.constant 3 : index
      %c0_15 = arith.constant 0 : index
      %41 = vector.load %arg4[%c3, %c0_15] : memref<7x128xf32, #tpu.memory_space<vmem>>, vector<1x128xf32>
      %42 = vector.broadcast %41 : vector<1x128xf32> to vector<16x128xf32>
      %43 = arith.mulf %40, %42 : vector<16x128xf32>
      %44 = arith.addf %37, %43 : vector<16x128xf32>
      %c9_i32 = arith.constant 9 : i32
      %45 = arith.addi %1, %c9_i32 : i32
      %46 = arith.index_cast %45 : i32 to index
      %c0_16 = arith.constant 0 : index
      %47 = vector.load %arg15[%46, %c0_16] : memref<64x128xf32, #tpu.memory_space<vmem>>, vector<16x128xf32>
      %c4 = arith.constant 4 : index
      %c0_17 = arith.constant 0 : index
      %48 = vector.load %arg4[%c4, %c0_17] : memref<7x128xf32, #tpu.memory_space<vmem>>, vector<1x128xf32>
      %49 = vector.broadcast %48 : vector<1x128xf32> to vector<16x128xf32>
      %50 = arith.mulf %47, %49 : vector<16x128xf32>
      %51 = arith.addf %44, %50 : vector<16x128xf32>
      %c10_i32 = arith.constant 10 : i32
      %52 = arith.addi %1, %c10_i32 : i32
      %53 = arith.index_cast %52 : i32 to index
      %c0_18 = arith.constant 0 : index
      %54 = vector.load %arg15[%53, %c0_18] : memref<64x128xf32, #tpu.memory_space<vmem>>, vector<16x128xf32>
      %c5 = arith.constant 5 : index
      %c0_19 = arith.constant 0 : index
      %55 = vector.load %arg4[%c5, %c0_19] : memref<7x128xf32, #tpu.memory_space<vmem>>, vector<1x128xf32>
      %56 = vector.broadcast %55 : vector<1x128xf32> to vector<16x128xf32>
      %57 = arith.mulf %54, %56 : vector<16x128xf32>
      %58 = arith.addf %51, %57 : vector<16x128xf32>
      %c11_i32 = arith.constant 11 : i32
      %59 = arith.addi %1, %c11_i32 : i32
      %60 = arith.index_cast %59 : i32 to index
      %c0_20 = arith.constant 0 : index
      %61 = vector.load %arg15[%60, %c0_20] : memref<64x128xf32, #tpu.memory_space<vmem>>, vector<16x128xf32>
      %c6 = arith.constant 6 : index
      %c0_21 = arith.constant 0 : index
      %62 = vector.load %arg4[%c6, %c0_21] : memref<7x128xf32, #tpu.memory_space<vmem>>, vector<1x128xf32>
      %63 = vector.broadcast %62 : vector<1x128xf32> to vector<16x128xf32>
      %64 = arith.mulf %61, %63 : vector<16x128xf32>
      %65 = arith.addf %58, %64 : vector<16x128xf32>
      %c0_22 = arith.constant 0 : index
      %c0_23 = arith.constant 0 : index
      %66 = vector.load %arg5[%c0_22, %c0_23] : memref<1x128xf32, #tpu.memory_space<vmem>>, vector<1x128xf32>
      %67 = vector.broadcast %66 : vector<1x128xf32> to vector<16x128xf32>
      %68 = arith.addf %65, %67 : vector<16x128xf32>
      %cst = arith.constant dense<0.000000e+00> : vector<16xf32>
      %69 = vector.multi_reduction <add>, %68, %cst [1] : vector<16x128xf32> to vector<16xf32>
      %70 = vector.shape_cast %69 : vector<16xf32> to vector<16x1xf32>
      %cst_24 = arith.constant 3.125000e-02 : f32
      %71 = vector.broadcast %cst_24 : f32 to vector<16x1xf32>
      %72 = arith.mulf %70, %71 : vector<16x1xf32>
      %73 = vector.broadcast %72 : vector<16x1xf32> to vector<16x128xf32>
      %74 = arith.subf %68, %73 : vector<16x128xf32>
      %75 = tpu.iota {dimensions = array<i32: 1>} : vector<16x128xi32>
      %c32_i32 = arith.constant 32 : i32
      %76 = vector.broadcast %c32_i32 : i32 to vector<16x128xi32>
      %77 = arith.cmpi slt, %75, %76 : vector<16x128xi32>
      %cst_25 = arith.constant 0.000000e+00 : f32
      %78 = vector.broadcast %cst_25 : f32 to vector<16x128xf32>
      %79 = arith.select %77, %74, %78 : vector<16x128xi1>, vector<16x128xf32>
      %80 = arith.mulf %79, %79 : vector<16x128xf32>
      %cst_26 = arith.constant dense<0.000000e+00> : vector<16xf32>
      %81 = vector.multi_reduction <add>, %80, %cst_26 [1] : vector<16x128xf32> to vector<16xf32>
      %82 = vector.shape_cast %81 : vector<16xf32> to vector<16x1xf32>
      %cst_27 = arith.constant 3.125000e-02 : f32
      %83 = vector.broadcast %cst_27 : f32 to vector<16x1xf32>
      %84 = arith.mulf %82, %83 : vector<16x1xf32>
      %cst_28 = arith.constant 9.99999997E-7 : f32
      %85 = vector.broadcast %cst_28 : f32 to vector<16x1xf32>
      %86 = arith.addf %84, %85 : vector<16x1xf32>
      %87 = math.rsqrt %86 : vector<16x1xf32>
      %88 = vector.broadcast %87 : vector<16x1xf32> to vector<16x128xf32>
      %89 = arith.mulf %74, %88 : vector<16x128xf32>
      %c0_29 = arith.constant 0 : index
      %c0_30 = arith.constant 0 : index
      %90 = vector.load %arg6[%c0_29, %c0_30] : memref<1x128xf32, #tpu.memory_space<vmem>>, vector<1x128xf32>
      %91 = vector.broadcast %90 : vector<1x128xf32> to vector<16x128xf32>
      %92 = arith.mulf %89, %91 : vector<16x128xf32>
      %c0_31 = arith.constant 0 : index
      %c0_32 = arith.constant 0 : index
      %93 = vector.load %arg7[%c0_31, %c0_32] : memref<1x128xf32, #tpu.memory_space<vmem>>, vector<1x128xf32>
      %94 = vector.broadcast %93 : vector<1x128xf32> to vector<16x128xf32>
      %95 = arith.addf %92, %94 : vector<16x128xf32>
      %96 = arith.truncf %95 : vector<16x128xf32> to vector<16x128xbf16>
      %c0_33 = arith.constant 0 : index
      %c0_34 = arith.constant 0 : index
      %97 = vector.load %arg8[%c0_33, %c0_34] : memref<128x128xbf16, #tpu.memory_space<vmem>>, vector<128x128xbf16>
      %cst_35 = arith.constant dense<0.000000e+00> : vector<16x128xf32>
      %98 = tpu.matmul %96, %97, %cst_35 {dimension_numbers = #tpu.dot_dimension_numbers<[1], [0], [0], [1], [0, 0, 1, 1], [], []>} : vector<16x128xbf16>, vector<128x128xbf16>, vector<16x128xf32> -> vector<16x128xf32>
      %c0_36 = arith.constant 0 : index
      %c0_37 = arith.constant 0 : index
      %99 = vector.load %arg9[%c0_36, %c0_37] : memref<1x128xf32, #tpu.memory_space<vmem>>, vector<1x128xf32>
      %100 = vector.broadcast %99 : vector<1x128xf32> to vector<16x128xf32>
      %101 = arith.addf %98, %100 : vector<16x128xf32>
      %cst_38 = arith.constant 5.000000e-01 : f32
      %102 = vector.broadcast %cst_38 : f32 to vector<16x128xf32>
      %103 = arith.mulf %102, %101 : vector<16x128xf32>
      %104 = arith.mulf %101, %101 : vector<16x128xf32>
      %105 = arith.mulf %104, %101 : vector<16x128xf32>
      %cst_39 = arith.constant 4.471500e-02 : f32
      %106 = vector.broadcast %cst_39 : f32 to vector<16x128xf32>
      %107 = arith.mulf %106, %105 : vector<16x128xf32>
      %108 = arith.addf %101, %107 : vector<16x128xf32>
      %cst_40 = arith.constant 0.797884583 : f32
      %109 = vector.broadcast %cst_40 : f32 to vector<16x128xf32>
      %110 = arith.mulf %109, %108 : vector<16x128xf32>
      %111 = math.tanh %110 : vector<16x128xf32>
      %cst_41 = arith.constant 1.000000e+00 : f32
      %112 = vector.broadcast %cst_41 : f32 to vector<16x128xf32>
      %113 = arith.addf %112, %111 : vector<16x128xf32>
      %114 = arith.mulf %103, %113 : vector<16x128xf32>
      %115 = arith.truncf %114 : vector<16x128xf32> to vector<16x128xbf16>
      %116 = arith.index_cast %1 : i32 to index
      %c0_42 = arith.constant 0 : index
      %117 = vector.load %arg16[%116, %c0_42] : memref<48x128xbf16, #tpu.memory_space<vmem>>, vector<16x128xbf16>
      tpu.vector_store %arg16[%116, %c0_42], %115 {strides = array<i32>} : memref<48x128xbf16, #tpu.memory_space<vmem>>, vector<16x128xbf16>,
      %c0_43 = arith.constant 0 : index
      %c0_44 = arith.constant 0 : index
      %118 = vector.load %arg17[%c0_43, %c0_44] : memref<1x128xf32, #tpu.memory_space<vmem>>, vector<1x128xf32>
      %119 = arith.mulf %114, %114 : vector<16x128xf32>
      %cst_45 = arith.constant dense<0.000000e+00> : vector<128xf32>
      %120 = vector.multi_reduction <add>, %119, %cst_45 [0] : vector<16x128xf32> to vector<128xf32>
      %121 = vector.shape_cast %120 : vector<128xf32> to vector<1x128xf32>
      %122 = arith.addf %118, %121 : vector<1x128xf32>
      %c0_46 = arith.constant 0 : index
      %c0_47 = arith.constant 0 : index
      %123 = vector.load %arg17[%c0_46, %c0_47] : memref<1x128xf32, #tpu.memory_space<vmem>>, vector<1x128xf32>
      tpu.vector_store %arg17[%c0_46, %c0_47], %122 {strides = array<i32>} : memref<1x128xf32, #tpu.memory_space<vmem>>, vector<1x128xf32>,
    } else {
    }
    %c1_i32 = arith.constant 1 : i32
    %10 = arith.cmpi eq, %arg1, %c1_i32 : i32
    %c0_i32_4 = arith.constant 0 : i32
    %11 = arith.cmpi eq, %arg2, %c0_i32_4 : i32
    %12 = arith.andi %10, %11 : i1
    %13 = arith.extui %12 : i1 to i32
    %c0_i32_5 = arith.constant 0 : i32
    %14 = arith.cmpi ne, %13, %c0_i32_5 : i32
    scf.if %14 {
      %c0 = arith.constant 0 : index
      %c0_8 = arith.constant 0 : index
      %18 = vector.load %arg17[%c0, %c0_8] : memref<1x128xf32, #tpu.memory_space<vmem>>, vector<1x128xf32>
      %19 = math.sqrt %18 : vector<1x128xf32>
      %cst = arith.constant dense<0.000000e+00> : vector<1xf32>
      %20 = vector.multi_reduction <add>, %19, %cst [1] : vector<1x128xf32> to vector<1xf32>
      %21 = vector.shape_cast %20 : vector<1xf32> to vector<1x1xf32>
      %cst_9 = arith.constant 1.562500e-02 : f32
      %22 = vector.broadcast %cst_9 : f32 to vector<1x1xf32>
      %23 = arith.mulf %21, %22 : vector<1x1xf32>
      %cst_10 = arith.constant 9.99999997E-7 : f32
      %24 = vector.broadcast %cst_10 : f32 to vector<1x1xf32>
      %25 = arith.addf %23, %24 : vector<1x1xf32>
      %26 = vector.broadcast %25 : vector<1x1xf32> to vector<1x128xf32>
      %27 = arith.divf %19, %26 : vector<1x128xf32>
      %c0_11 = arith.constant 0 : index
      %c0_12 = arith.constant 0 : index
      %28 = vector.load %arg18[%c0_11, %c0_12] : memref<1x128xf32, #tpu.memory_space<vmem>>, vector<1x128xf32>
      tpu.vector_store %arg18[%c0_11, %c0_12], %27 {strides = array<i32>} : memref<1x128xf32, #tpu.memory_space<vmem>>, vector<1x128xf32>,
    } else {
    }
    %c1_i32_6 = arith.constant 1 : i32
    %15 = arith.cmpi eq, %arg1, %c1_i32_6 : i32
    %16 = arith.extui %15 : i1 to i32
    %c0_i32_7 = arith.constant 0 : i32
    %17 = arith.cmpi ne, %16, %c0_i32_7 : i32
    scf.if %17 {
      %18 = arith.index_cast %1 : i32 to index
      %c0 = arith.constant 0 : index
      %19 = vector.load %arg16[%18, %c0] : memref<48x128xbf16, #tpu.memory_space<vmem>>, vector<16x128xbf16>
      %20 = arith.extf %19 : vector<16x128xbf16> to vector<16x128xf32>
      %c0_8 = arith.constant 0 : index
      %c0_9 = arith.constant 0 : index
      %21 = vector.load %arg10[%c0_8, %c0_9] : memref<1x128xf32, #tpu.memory_space<vmem>>, vector<1x128xf32>
      %c0_10 = arith.constant 0 : index
      %c0_11 = arith.constant 0 : index
      %22 = vector.load %arg18[%c0_10, %c0_11] : memref<1x128xf32, #tpu.memory_space<vmem>>, vector<1x128xf32>
      %23 = vector.broadcast %22 : vector<1x128xf32> to vector<16x128xf32>
      %24 = arith.mulf %20, %23 : vector<16x128xf32>
      %25 = vector.broadcast %21 : vector<1x128xf32> to vector<16x128xf32>
      %26 = arith.mulf %25, %24 : vector<16x128xf32>
      %c0_12 = arith.constant 0 : index
      %c0_13 = arith.constant 0 : index
      %27 = vector.load %arg11[%c0_12, %c0_13] : memref<1x128xf32, #tpu.memory_space<vmem>>, vector<1x128xf32>
      %28 = vector.broadcast %27 : vector<1x128xf32> to vector<16x128xf32>
      %29 = arith.addf %26, %28 : vector<16x128xf32>
      %30 = arith.addf %29, %20 : vector<16x128xf32>
      %31 = arith.truncf %30 : vector<16x128xf32> to vector<16x128xbf16>
      %c0_14 = arith.constant 0 : index
      %c0_15 = arith.constant 0 : index
      %32 = vector.load %arg12[%c0_14, %c0_15] : memref<128x128xbf16, #tpu.memory_space<vmem>>, vector<128x128xbf16>
      %cst = arith.constant dense<0.000000e+00> : vector<16x128xf32>
      %33 = tpu.matmul %31, %32, %cst {dimension_numbers = #tpu.dot_dimension_numbers<[1], [0], [0], [1], [0, 0, 1, 1], [], []>} : vector<16x128xbf16>, vector<128x128xbf16>, vector<16x128xf32> -> vector<16x128xf32>
      %c0_16 = arith.constant 0 : index
      %c0_17 = arith.constant 0 : index
      %34 = vector.load %arg13[%c0_16, %c0_17] : memref<1x128xf32, #tpu.memory_space<vmem>>, vector<1x128xf32>
      %35 = vector.broadcast %34 : vector<1x128xf32> to vector<16x128xf32>
      %36 = arith.addf %33, %35 : vector<16x128xf32>
      %c8_i32 = arith.constant 8 : i32
      %37 = arith.addi %1, %c8_i32 : i32
      %38 = tpu.assume_multiple %37, 8 : i32
      %39 = arith.index_cast %38 : i32 to index
      %c0_18 = arith.constant 0 : index
      %40 = vector.load %arg15[%39, %c0_18] : memref<64x128xf32, #tpu.memory_space<vmem>>, vector<16x128xf32>
      %41 = arith.addf %40, %36 : vector<16x128xf32>
      %c0_19 = arith.constant 0 : index
      %c0_20 = arith.constant 0 : index
      %c0_21 = arith.constant 0 : index
      %42 = vector.load %arg14[%c0_19, %c0_20, %c0_21] : memref<1x16x128xf32, #tpu.memory_space<vmem>>, vector<1x16x128xf32>
      %43 = vector.shape_cast %42 : vector<1x16x128xf32> to vector<16x128xf32>
      %44 = vector.shape_cast %41 : vector<16x128xf32> to vector<1x16x128xf32>
      tpu.vector_store %arg14[%c0_19, %c0_20, %c0_21], %44 {strides = array<i32>} : memref<1x16x128xf32, #tpu.memory_space<vmem>>, vector<1x16x128xf32>,
    } else {
    }
    return
  }
  func.func @transform_1(%arg0: i32, %arg1: i32, %arg2: i32) -> (i32, i32) {
    %c0_i32 = arith.constant 0 : i32
    %c0_i32_0 = arith.constant 0 : i32
    %c0_i32_1 = arith.constant 0 : i32
    return %c0_i32, %c0_i32_0 : i32, i32
  }
  func.func @transform_2(%arg0: i32, %arg1: i32, %arg2: i32) -> (i32, i32) {
    %c0_i32 = arith.constant 0 : i32
    %c0_i32_0 = arith.constant 0 : i32
    %c0_i32_1 = arith.constant 0 : i32
    return %c0_i32, %c0_i32_0 : i32, i32
  }
  func.func @transform_3(%arg0: i32, %arg1: i32, %arg2: i32) -> (i32, i32) {
    %c0_i32 = arith.constant 0 : i32
    %c0_i32_0 = arith.constant 0 : i32
    %c0_i32_1 = arith.constant 0 : i32
    return %c0_i32, %c0_i32_0 : i32, i32
  }
  func.func @transform_4(%arg0: i32, %arg1: i32, %arg2: i32) -> (i32, i32) {
    %c0_i32 = arith.constant 0 : i32
    %c0_i32_0 = arith.constant 0 : i32
    %c0_i32_1 = arith.constant 0 : i32
    return %c0_i32, %c0_i32_0 : i32, i32
  }
  func.func @transform_5(%arg0: i32, %arg1: i32, %arg2: i32) -> (i32, i32) {
    %c0_i32 = arith.constant 0 : i32
    %c0_i32_0 = arith.constant 0 : i32
    %c0_i32_1 = arith.constant 0 : i32
    return %c0_i32, %c0_i32_0 : i32, i32
  }
  func.func @transform_6(%arg0: i32, %arg1: i32, %arg2: i32) -> (i32, i32) {
    %c0_i32 = arith.constant 0 : i32
    %c0_i32_0 = arith.constant 0 : i32
    %c0_i32_1 = arith.constant 0 : i32
    return %c0_i32, %c0_i32_0 : i32, i32
  }
  func.func @transform_7(%arg0: i32, %arg1: i32, %arg2: i32) -> (i32, i32) {
    %c0_i32 = arith.constant 0 : i32
    %c0_i32_0 = arith.constant 0 : i32
    %c0_i32_1 = arith.constant 0 : i32
    return %c0_i32, %c0_i32_0 : i32, i32
  }
  func.func @transform_8(%arg0: i32, %arg1: i32, %arg2: i32) -> (i32, i32) {
    %c0_i32 = arith.constant 0 : i32
    %c0_i32_0 = arith.constant 0 : i32
    %c0_i32_1 = arith.constant 0 : i32
    return %c0_i32, %c0_i32_0 : i32, i32
  }
  func.func @transform_9(%arg0: i32, %arg1: i32, %arg2: i32) -> (i32, i32) {
    %c0_i32 = arith.constant 0 : i32
    %c0_i32_0 = arith.constant 0 : i32
    %c0_i32_1 = arith.constant 0 : i32
    return %c0_i32, %c0_i32_0 : i32, i32
  }
  func.func @transform_10(%arg0: i32, %arg1: i32, %arg2: i32) -> (i32, i32) {
    %c0_i32 = arith.constant 0 : i32
    %c0_i32_0 = arith.constant 0 : i32
    %c0_i32_1 = arith.constant 0 : i32
    return %c0_i32, %c0_i32_0 : i32, i32
  }
  func.func @transform_11(%arg0: i32, %arg1: i32, %arg2: i32) -> (i32, i32, i32) {
    %0 = arith.muli %arg1, %arg2 : i32
    %c0_i32 = arith.constant 0 : i32
    %c0_i32_0 = arith.constant 0 : i32
    return %arg0, %0, %c0_i32 : i32, i32, i32
  }
}

module attributes {stable_mosaic.version = 11 : i64} {
  func.func @_convnext_kernel(%arg0: i32, %arg1: i32, %arg2: i32, %arg3: memref<2x48x128xf32, #tpu.memory_space<any>>, %arg4: memref<7x128xf32, #tpu.memory_space<vmem>>, %arg5: memref<1x128xf32, #tpu.memory_space<vmem>>, %arg6: memref<1x128xf32, #tpu.memory_space<vmem>>, %arg7: memref<1x128xf32, #tpu.memory_space<vmem>>, %arg8: memref<128x128xbf16, #tpu.memory_space<vmem>>, %arg9: memref<1x128xf32, #tpu.memory_space<vmem>>, %arg10: memref<1x128xf32, #tpu.memory_space<vmem>>, %arg11: memref<1x128xf32, #tpu.memory_space<vmem>>, %arg12: memref<128x128xbf16, #tpu.memory_space<vmem>>, %arg13: memref<1x128xf32, #tpu.memory_space<vmem>>, %arg14: memref<1x16x128xf32, #tpu.memory_space<vmem>>, %arg15: memref<64x128xf32, #tpu.memory_space<vmem>>, %arg16: memref<48x128xbf16, #tpu.memory_space<vmem>>, %arg17: memref<1x128xf32, #tpu.memory_space<vmem>>, %arg18: memref<1x128xf32, #tpu.memory_space<vmem>>, %arg19: memref<!tpu.dma_semaphore, #tpu.memory_space<semaphore_mem>>) attributes {dimension_semantics = [#tpu.dimension_semantics<parallel>, #tpu.dimension_semantics<arbitrary>, #tpu.dimension_semantics<arbitrary>], iteration_bounds = array<i64: 2, 2, 3>, scalar_prefetch = 0 : i64, scratch_operands = 5 : i64, tpu.core_type = #tpu.core_type<tc>, window_params = [{}, {pipeline_mode = #tpu.pipeline_mode<synchronous>, transform_indices = @transform_1, window_bounds = array<i64: 7, 128>}, {pipeline_mode = #tpu.pipeline_mode<synchronous>, transform_indices = @transform_2, window_bounds = array<i64: 1, 128>}, {pipeline_mode = #tpu.pipeline_mode<synchronous>, transform_indices = @transform_3, window_bounds = array<i64: 1, 128>}, {pipeline_mode = #tpu.pipeline_mode<synchronous>, transform_indices = @transform_4, window_bounds = array<i64: 1, 128>}, {pipeline_mode = #tpu.pipeline_mode<synchronous>, transform_indices = @transform_5, window_bounds = array<i64: 128, 128>}, {pipeline_mode = #tpu.pipeline_mode<synchronous>, transform_indices = @transform_6, window_bounds = array<i64: 1, 128>}, {pipeline_mode = #tpu.pipeline_mode<synchronous>, transform_indices = @transform_7, window_bounds = array<i64: 1, 128>}, {pipeline_mode = #tpu.pipeline_mode<synchronous>, transform_indices = @transform_8, window_bounds = array<i64: 1, 128>}, {pipeline_mode = #tpu.pipeline_mode<synchronous>, transform_indices = @transform_9, window_bounds = array<i64: 128, 128>}, {pipeline_mode = #tpu.pipeline_mode<synchronous>, transform_indices = @transform_10, window_bounds = array<i64: 1, 128>}, {transform_indices = @transform_11, window_bounds = array<i64: 1, 16, 128>}]} {
    %c16_i32 = arith.constant 16 : i32
    %0 = arith.muli %arg2, %c16_i32 : i32
    %1 = tpu.assume_multiple %0, 16 : i32
    %c0_i32 = arith.constant 0 : i32
    %2 = arith.cmpi eq, %arg1, %c0_i32 : i32
    %c0_i32_0 = arith.constant 0 : i32
    %3 = arith.cmpi eq, %arg2, %c0_i32_0 : i32
    %4 = arith.andi %2, %3 : i1
    %5 = arith.extui %4 : i1 to i32
    %c0_i32_1 = arith.constant 0 : i32
    %6 = arith.cmpi ne, %5, %c0_i32_1 : i32
    scf.if %6 {
      %c0_i32_8 = arith.constant 0 : i32
      %c0_i32_9 = arith.constant 0 : i32
      %18 = tpu.memref_slice %arg3[%arg0, %c0_i32_8, %c0_i32_9] : memref<2x48x128xf32, #tpu.memory_space<any>> -> memref<1x48x128xf32, #tpu.memory_space<any>>
      %19 = tpu.memref_squeeze %18 : memref<1x48x128xf32, #tpu.memory_space<any>> -> memref<48x128xf32, #tpu.memory_space<any>>
      %c8_i32 = arith.constant 8 : i32
      %c0_i32_10 = arith.constant 0 : i32
      %20 = tpu.memref_slice %arg15[%c8_i32, %c0_i32_10] : memref<64x128xf32, #tpu.memory_space<vmem>> -> memref<48x128xf32, #tpu.memory_space<vmem>>
      tpu.enqueue_dma source(%19 : memref<48x128xf32, #tpu.memory_space<any>>) target(%20 : memref<48x128xf32, #tpu.memory_space<vmem>>) target_semaphore(%arg19 : memref<!tpu.dma_semaphore, #tpu.memory_space<semaphore_mem>>)
      %cst = arith.constant 0.000000e+00 : f32
      %21 = vector.broadcast %cst : f32 to vector<1x128xf32>
      %c0 = arith.constant 0 : index
      %c0_11 = arith.constant 0 : index
      %22 = vector.load %arg17[%c0, %c0_11] : memref<1x128xf32, #tpu.memory_space<vmem>>, vector<1x128xf32>
      tpu.vector_store %arg17[%c0, %c0_11], %21 {strides = array<i32>} : memref<1x128xf32, #tpu.memory_space<vmem>>, vector<1x128xf32>,
      %c0_i32_12 = arith.constant 0 : i32
      %c0_i32_13 = arith.constant 0 : i32
      %23 = tpu.memref_slice %arg3[%arg0, %c0_i32_12, %c0_i32_13] : memref<2x48x128xf32, #tpu.memory_space<any>> -> memref<1x48x128xf32, #tpu.memory_space<any>>
      %24 = tpu.memref_squeeze %23 : memref<1x48x128xf32, #tpu.memory_space<any>> -> memref<48x128xf32, #tpu.memory_space<any>>
      %c8_i32_14 = arith.constant 8 : i32
      %c0_i32_15 = arith.constant 0 : i32
      %25 = tpu.memref_slice %arg15[%c8_i32_14, %c0_i32_15] : memref<64x128xf32, #tpu.memory_space<vmem>> -> memref<48x128xf32, #tpu.memory_space<vmem>>
      tpu.wait_dma2 semaphore(%arg19 : memref<!tpu.dma_semaphore, #tpu.memory_space<semaphore_mem>>) src(%24 : memref<48x128xf32, #tpu.memory_space<any>>) dst(%25 : memref<48x128xf32, #tpu.memory_space<vmem>>)
      %cst_16 = arith.constant 0.000000e+00 : f32
      %26 = vector.broadcast %cst_16 : f32 to vector<8x128xf32>
      %c0_17 = arith.constant 0 : index
      %c0_18 = arith.constant 0 : index
      %27 = vector.load %arg15[%c0_17, %c0_18] : memref<64x128xf32, #tpu.memory_space<vmem>>, vector<8x128xf32>
      tpu.vector_store %arg15[%c0_17, %c0_18], %26 {strides = array<i32>} : memref<64x128xf32, #tpu.memory_space<vmem>>, vector<8x128xf32>,
      %cst_19 = arith.constant 0.000000e+00 : f32
      %28 = vector.broadcast %cst_19 : f32 to vector<8x128xf32>
      %c56 = arith.constant 56 : index
      %c0_20 = arith.constant 0 : index
      %29 = vector.load %arg15[%c56, %c0_20] : memref<64x128xf32, #tpu.memory_space<vmem>>, vector<8x128xf32>
      tpu.vector_store %arg15[%c56, %c0_20], %28 {strides = array<i32>} : memref<64x128xf32, #tpu.memory_space<vmem>>, vector<8x128xf32>,
    } else {
    }
    %c0_i32_2 = arith.constant 0 : i32
    %7 = arith.cmpi eq, %arg1, %c0_i32_2 : i32
    %8 = arith.extui %7 : i1 to i32
    %c0_i32_3 = arith.constant 0 : i32
    %9 = arith.cmpi ne, %8, %c0_i32_3 : i32
    scf.if %9 {
      %c5_i32 = arith.constant 5 : i32
      %18 = arith.addi %1, %c5_i32 : i32
      %19 = arith.index_cast %18 : i32 to index
      %c0 = arith.constant 0 : index
      %20 = vector.load %arg15[%19, %c0] : memref<64x128xf32, #tpu.memory_space<vmem>>, vector<16x128xf32>
      %c0_8 = arith.constant 0 : index
      %c0_9 = arith.constant 0 : index
      %21 = vector.load %arg4[%c0_8, %c0_9] : memref<7x128xf32, #tpu.memory_space<vmem>>, vector<1x128xf32>
      %22 = vector.broadcast %21 : vector<1x128xf32> to vector<16x128xf32>
      %23 = arith.mulf %20, %22 : vector<16x128xf32>
      %c6_i32 = arith.constant 6 : i32
      %24 = arith.addi %1, %c6_i32 : i32
      %25 = arith.index_cast %24 : i32 to index
      %c0_10 = arith.constant 0 : index
      %26 = vector.load %arg15[%25, %c0_10] : memref<64x128xf32, #tpu.memory_space<vmem>>, vector<16x128xf32>
      %c1 = arith.constant 1 : index
      %c0_11 = arith.constant 0 : index
      %27 = vector.load %arg4[%c1, %c0_11] : memref<7x128xf32, #tpu.memory_space<vmem>>, vector<1x128xf32>
      %28 = vector.broadcast %27 : vector<1x128xf32> to vector<16x128xf32>
      %29 = arith.mulf %26, %28 : vector<16x128xf32>
      %30 = arith.addf %23, %29 : vector<16x128xf32>
      %c7_i32 = arith.constant 7 : i32
      %31 = arith.addi %1, %c7_i32 : i32
      %32 = arith.index_cast %31 : i32 to index
      %c0_12 = arith.constant 0 : index
      %33 = vector.load %arg15[%32, %c0_12] : memref<64x128xf32, #tpu.memory_space<vmem>>, vector<16x128xf32>
      %c2 = arith.constant 2 : index
      %c0_13 = arith.constant 0 : index
      %34 = vector.load %arg4[%c2, %c0_13] : memref<7x128xf32, #tpu.memory_space<vmem>>, vector<1x128xf32>
      %35 = vector.broadcast %34 : vector<1x128xf32> to vector<16x128xf32>
      %36 = arith.mulf %33, %35 : vector<16x128xf32>
      %37 = arith.addf %30, %36 : vector<16x128xf32>
      %c8_i32 = arith.constant 8 : i32
      %38 = arith.addi %1, %c8_i32 : i32
      %39 = arith.index_cast %38 : i32 to index
      %c0_14 = arith.constant 0 : index
      %40 = vector.load %arg15[%39, %c0_14] : memref<64x128xf32, #tpu.memory_space<vmem>>, vector<16x128xf32>
      %c3 = arith.constant 3 : index
      %c0_15 = arith.constant 0 : index
      %41 = vector.load %arg4[%c3, %c0_15] : memref<7x128xf32, #tpu.memory_space<vmem>>, vector<1x128xf32>
      %42 = vector.broadcast %41 : vector<1x128xf32> to vector<16x128xf32>
      %43 = arith.mulf %40, %42 : vector<16x128xf32>
      %44 = arith.addf %37, %43 : vector<16x128xf32>
      %c9_i32 = arith.constant 9 : i32
      %45 = arith.addi %1, %c9_i32 : i32
      %46 = arith.index_cast %45 : i32 to index
      %c0_16 = arith.constant 0 : index
      %47 = vector.load %arg15[%46, %c0_16] : memref<64x128xf32, #tpu.memory_space<vmem>>, vector<16x128xf32>
      %c4 = arith.constant 4 : index
      %c0_17 = arith.constant 0 : index
      %48 = vector.load %arg4[%c4, %c0_17] : memref<7x128xf32, #tpu.memory_space<vmem>>, vector<1x128xf32>
      %49 = vector.broadcast %48 : vector<1x128xf32> to vector<16x128xf32>
      %50 = arith.mulf %47, %49 : vector<16x128xf32>
      %51 = arith.addf %44, %50 : vector<16x128xf32>
      %c10_i32 = arith.constant 10 : i32
      %52 = arith.addi %1, %c10_i32 : i32
      %53 = arith.index_cast %52 : i32 to index
      %c0_18 = arith.constant 0 : index
      %54 = vector.load %arg15[%53, %c0_18] : memref<64x128xf32, #tpu.memory_space<vmem>>, vector<16x128xf32>
      %c5 = arith.constant 5 : index
      %c0_19 = arith.constant 0 : index
      %55 = vector.load %arg4[%c5, %c0_19] : memref<7x128xf32, #tpu.memory_space<vmem>>, vector<1x128xf32>
      %56 = vector.broadcast %55 : vector<1x128xf32> to vector<16x128xf32>
      %57 = arith.mulf %54, %56 : vector<16x128xf32>
      %58 = arith.addf %51, %57 : vector<16x128xf32>
      %c11_i32 = arith.constant 11 : i32
      %59 = arith.addi %1, %c11_i32 : i32
      %60 = arith.index_cast %59 : i32 to index
      %c0_20 = arith.constant 0 : index
      %61 = vector.load %arg15[%60, %c0_20] : memref<64x128xf32, #tpu.memory_space<vmem>>, vector<16x128xf32>
      %c6 = arith.constant 6 : index
      %c0_21 = arith.constant 0 : index
      %62 = vector.load %arg4[%c6, %c0_21] : memref<7x128xf32, #tpu.memory_space<vmem>>, vector<1x128xf32>
      %63 = vector.broadcast %62 : vector<1x128xf32> to vector<16x128xf32>
      %64 = arith.mulf %61, %63 : vector<16x128xf32>
      %65 = arith.addf %58, %64 : vector<16x128xf32>
      %c0_22 = arith.constant 0 : index
      %c0_23 = arith.constant 0 : index
      %66 = vector.load %arg5[%c0_22, %c0_23] : memref<1x128xf32, #tpu.memory_space<vmem>>, vector<1x128xf32>
      %67 = vector.broadcast %66 : vector<1x128xf32> to vector<16x128xf32>
      %68 = arith.addf %65, %67 : vector<16x128xf32>
      %cst = arith.constant dense<0.000000e+00> : vector<16xf32>
      %69 = vector.multi_reduction <add>, %68, %cst [1] : vector<16x128xf32> to vector<16xf32>
      %70 = vector.shape_cast %69 : vector<16xf32> to vector<16x1xf32>
      %cst_24 = arith.constant 3.125000e-02 : f32
      %71 = vector.broadcast %cst_24 : f32 to vector<16x1xf32>
      %72 = arith.mulf %70, %71 : vector<16x1xf32>
      %73 = vector.broadcast %72 : vector<16x1xf32> to vector<16x128xf32>
      %74 = arith.subf %68, %73 : vector<16x128xf32>
      %75 = tpu.iota {dimensions = array<i32: 1>} : vector<16x128xi32>
      %c32_i32 = arith.constant 32 : i32
      %76 = vector.broadcast %c32_i32 : i32 to vector<16x128xi32>
      %77 = arith.cmpi slt, %75, %76 : vector<16x128xi32>
      %cst_25 = arith.constant 0.000000e+00 : f32
      %78 = vector.broadcast %cst_25 : f32 to vector<16x128xf32>
      %79 = arith.select %77, %74, %78 : vector<16x128xi1>, vector<16x128xf32>
      %80 = arith.mulf %79, %79 : vector<16x128xf32>
      %cst_26 = arith.constant dense<0.000000e+00> : vector<16xf32>
      %81 = vector.multi_reduction <add>, %80, %cst_26 [1] : vector<16x128xf32> to vector<16xf32>
      %82 = vector.shape_cast %81 : vector<16xf32> to vector<16x1xf32>
      %cst_27 = arith.constant 3.125000e-02 : f32
      %83 = vector.broadcast %cst_27 : f32 to vector<16x1xf32>
      %84 = arith.mulf %82, %83 : vector<16x1xf32>
      %cst_28 = arith.constant 9.99999997E-7 : f32
      %85 = vector.broadcast %cst_28 : f32 to vector<16x1xf32>
      %86 = arith.addf %84, %85 : vector<16x1xf32>
      %87 = math.rsqrt %86 : vector<16x1xf32>
      %88 = vector.broadcast %87 : vector<16x1xf32> to vector<16x128xf32>
      %89 = arith.mulf %74, %88 : vector<16x128xf32>
      %c0_29 = arith.constant 0 : index
      %c0_30 = arith.constant 0 : index
      %90 = vector.load %arg6[%c0_29, %c0_30] : memref<1x128xf32, #tpu.memory_space<vmem>>, vector<1x128xf32>
      %91 = vector.broadcast %90 : vector<1x128xf32> to vector<16x128xf32>
      %92 = arith.mulf %89, %91 : vector<16x128xf32>
      %c0_31 = arith.constant 0 : index
      %c0_32 = arith.constant 0 : index
      %93 = vector.load %arg7[%c0_31, %c0_32] : memref<1x128xf32, #tpu.memory_space<vmem>>, vector<1x128xf32>
      %94 = vector.broadcast %93 : vector<1x128xf32> to vector<16x128xf32>
      %95 = arith.addf %92, %94 : vector<16x128xf32>
      %96 = arith.truncf %95 : vector<16x128xf32> to vector<16x128xbf16>
      %c0_33 = arith.constant 0 : index
      %c0_34 = arith.constant 0 : index
      %97 = vector.load %arg8[%c0_33, %c0_34] : memref<128x128xbf16, #tpu.memory_space<vmem>>, vector<128x128xbf16>
      %cst_35 = arith.constant dense<0.000000e+00> : vector<16x128xf32>
      %98 = tpu.matmul %96, %97, %cst_35 {dimension_numbers = #tpu.dot_dimension_numbers<[1], [0], [0], [1], [0, 0, 1, 1], [], []>} : vector<16x128xbf16>, vector<128x128xbf16>, vector<16x128xf32> -> vector<16x128xf32>
      %c0_36 = arith.constant 0 : index
      %c0_37 = arith.constant 0 : index
      %99 = vector.load %arg9[%c0_36, %c0_37] : memref<1x128xf32, #tpu.memory_space<vmem>>, vector<1x128xf32>
      %100 = vector.broadcast %99 : vector<1x128xf32> to vector<16x128xf32>
      %101 = arith.addf %98, %100 : vector<16x128xf32>
      %cst_38 = arith.constant 5.000000e-01 : f32
      %102 = vector.broadcast %cst_38 : f32 to vector<16x128xf32>
      %103 = arith.mulf %102, %101 : vector<16x128xf32>
      %104 = arith.mulf %101, %101 : vector<16x128xf32>
      %105 = arith.mulf %104, %101 : vector<16x128xf32>
      %cst_39 = arith.constant 4.471500e-02 : f32
      %106 = vector.broadcast %cst_39 : f32 to vector<16x128xf32>
      %107 = arith.mulf %106, %105 : vector<16x128xf32>
      %108 = arith.addf %101, %107 : vector<16x128xf32>
      %cst_40 = arith.constant 0.797884583 : f32
      %109 = vector.broadcast %cst_40 : f32 to vector<16x128xf32>
      %110 = arith.mulf %109, %108 : vector<16x128xf32>
      %111 = math.tanh %110 : vector<16x128xf32>
      %cst_41 = arith.constant 1.000000e+00 : f32
      %112 = vector.broadcast %cst_41 : f32 to vector<16x128xf32>
      %113 = arith.addf %112, %111 : vector<16x128xf32>
      %114 = arith.mulf %103, %113 : vector<16x128xf32>
      %115 = arith.truncf %114 : vector<16x128xf32> to vector<16x128xbf16>
      %116 = arith.index_cast %1 : i32 to index
      %c0_42 = arith.constant 0 : index
      %117 = vector.load %arg16[%116, %c0_42] : memref<48x128xbf16, #tpu.memory_space<vmem>>, vector<16x128xbf16>
      tpu.vector_store %arg16[%116, %c0_42], %115 {strides = array<i32>} : memref<48x128xbf16, #tpu.memory_space<vmem>>, vector<16x128xbf16>,
      %c0_43 = arith.constant 0 : index
      %c0_44 = arith.constant 0 : index
      %118 = vector.load %arg17[%c0_43, %c0_44] : memref<1x128xf32, #tpu.memory_space<vmem>>, vector<1x128xf32>
      %119 = arith.mulf %114, %114 : vector<16x128xf32>
      %cst_45 = arith.constant dense<0.000000e+00> : vector<128xf32>
      %120 = vector.multi_reduction <add>, %119, %cst_45 [0] : vector<16x128xf32> to vector<128xf32>
      %121 = vector.shape_cast %120 : vector<128xf32> to vector<1x128xf32>
      %122 = arith.addf %118, %121 : vector<1x128xf32>
      %c0_46 = arith.constant 0 : index
      %c0_47 = arith.constant 0 : index
      %123 = vector.load %arg17[%c0_46, %c0_47] : memref<1x128xf32, #tpu.memory_space<vmem>>, vector<1x128xf32>
      tpu.vector_store %arg17[%c0_46, %c0_47], %122 {strides = array<i32>} : memref<1x128xf32, #tpu.memory_space<vmem>>, vector<1x128xf32>,
    } else {
    }
    %c1_i32 = arith.constant 1 : i32
    %10 = arith.cmpi eq, %arg1, %c1_i32 : i32
    %c0_i32_4 = arith.constant 0 : i32
    %11 = arith.cmpi eq, %arg2, %c0_i32_4 : i32
    %12 = arith.andi %10, %11 : i1
    %13 = arith.extui %12 : i1 to i32
    %c0_i32_5 = arith.constant 0 : i32
    %14 = arith.cmpi ne, %13, %c0_i32_5 : i32
    scf.if %14 {
      %c0 = arith.constant 0 : index
      %c0_8 = arith.constant 0 : index
      %18 = vector.load %arg17[%c0, %c0_8] : memref<1x128xf32, #tpu.memory_space<vmem>>, vector<1x128xf32>
      %19 = math.sqrt %18 : vector<1x128xf32>
      %cst = arith.constant dense<0.000000e+00> : vector<1xf32>
      %20 = vector.multi_reduction <add>, %19, %cst [1] : vector<1x128xf32> to vector<1xf32>
      %21 = vector.shape_cast %20 : vector<1xf32> to vector<1x1xf32>
      %cst_9 = arith.constant 1.562500e-02 : f32
      %22 = vector.broadcast %cst_9 : f32 to vector<1x1xf32>
      %23 = arith.mulf %21, %22 : vector<1x1xf32>
      %cst_10 = arith.constant 9.99999997E-7 : f32
      %24 = vector.broadcast %cst_10 : f32 to vector<1x1xf32>
      %25 = arith.addf %23, %24 : vector<1x1xf32>
      %26 = vector.broadcast %25 : vector<1x1xf32> to vector<1x128xf32>
      %27 = arith.divf %19, %26 : vector<1x128xf32>
      %c0_11 = arith.constant 0 : index
      %c0_12 = arith.constant 0 : index
      %28 = vector.load %arg18[%c0_11, %c0_12] : memref<1x128xf32, #tpu.memory_space<vmem>>, vector<1x128xf32>
      tpu.vector_store %arg18[%c0_11, %c0_12], %27 {strides = array<i32>} : memref<1x128xf32, #tpu.memory_space<vmem>>, vector<1x128xf32>,
    } else {
    }
    %c1_i32_6 = arith.constant 1 : i32
    %15 = arith.cmpi eq, %arg1, %c1_i32_6 : i32
    %16 = arith.extui %15 : i1 to i32
    %c0_i32_7 = arith.constant 0 : i32
    %17 = arith.cmpi ne, %16, %c0_i32_7 : i32
    scf.if %17 {
      %18 = arith.index_cast %1 : i32 to index
      %c0 = arith.constant 0 : index
      %19 = vector.load %arg16[%18, %c0] : memref<48x128xbf16, #tpu.memory_space<vmem>>, vector<16x128xbf16>
      %20 = arith.extf %19 : vector<16x128xbf16> to vector<16x128xf32>
      %c0_8 = arith.constant 0 : index
      %c0_9 = arith.constant 0 : index
      %21 = vector.load %arg10[%c0_8, %c0_9] : memref<1x128xf32, #tpu.memory_space<vmem>>, vector<1x128xf32>
      %c0_10 = arith.constant 0 : index
      %c0_11 = arith.constant 0 : index
      %22 = vector.load %arg18[%c0_10, %c0_11] : memref<1x128xf32, #tpu.memory_space<vmem>>, vector<1x128xf32>
      %23 = vector.broadcast %22 : vector<1x128xf32> to vector<16x128xf32>
      %24 = arith.mulf %20, %23 : vector<16x128xf32>
      %25 = vector.broadcast %21 : vector<1x128xf32> to vector<16x128xf32>
      %26 = arith.mulf %25, %24 : vector<16x128xf32>
      %c0_12 = arith.constant 0 : index
      %c0_13 = arith.constant 0 : index
      %27 = vector.load %arg11[%c0_12, %c0_13] : memref<1x128xf32, #tpu.memory_space<vmem>>, vector<1x128xf32>
      %28 = vector.broadcast %27 : vector<1x128xf32> to vector<16x128xf32>
      %29 = arith.addf %26, %28 : vector<16x128xf32>
      %30 = arith.addf %29, %20 : vector<16x128xf32>
      %31 = arith.truncf %30 : vector<16x128xf32> to vector<16x128xbf16>
      %c0_14 = arith.constant 0 : index
      %c0_15 = arith.constant 0 : index
      %32 = vector.load %arg12[%c0_14, %c0_15] : memref<128x128xbf16, #tpu.memory_space<vmem>>, vector<128x128xbf16>
      %cst = arith.constant dense<0.000000e+00> : vector<16x128xf32>
      %33 = tpu.matmul %31, %32, %cst {dimension_numbers = #tpu.dot_dimension_numbers<[1], [0], [0], [1], [0, 0, 1, 1], [], []>} : vector<16x128xbf16>, vector<128x128xbf16>, vector<16x128xf32> -> vector<16x128xf32>
      %c0_16 = arith.constant 0 : index
      %c0_17 = arith.constant 0 : index
      %34 = vector.load %arg13[%c0_16, %c0_17] : memref<1x128xf32, #tpu.memory_space<vmem>>, vector<1x128xf32>
      %35 = vector.broadcast %34 : vector<1x128xf32> to vector<16x128xf32>
      %36 = arith.addf %33, %35 : vector<16x128xf32>
      %c8_i32 = arith.constant 8 : i32
      %37 = arith.addi %1, %c8_i32 : i32
      %38 = tpu.assume_multiple %37, 8 : i32
      %39 = arith.index_cast %38 : i32 to index
      %c0_18 = arith.constant 0 : index
      %40 = vector.load %arg15[%39, %c0_18] : memref<64x128xf32, #tpu.memory_space<vmem>>, vector<16x128xf32>
      %41 = arith.addf %40, %36 : vector<16x128xf32>
      %c0_19 = arith.constant 0 : index
      %c0_20 = arith.constant 0 : index
      %c0_21 = arith.constant 0 : index
      %42 = vector.load %arg14[%c0_19, %c0_20, %c0_21] : memref<1x16x128xf32, #tpu.memory_space<vmem>>, vector<1x16x128xf32>
      %43 = vector.shape_cast %42 : vector<1x16x128xf32> to vector<16x128xf32>
      %44 = vector.shape_cast %41 : vector<16x128xf32> to vector<1x16x128xf32>
      tpu.vector_store %arg14[%c0_19, %c0_20, %c0_21], %44 {strides = array<i32>} : memref<1x16x128xf32, #tpu.memory_space<vmem>>, vector<1x16x128xf32>,
    } else {
    }
    return
  }
  func.func @transform_1(%arg0: i32, %arg1: i32, %arg2: i32) -> (i32, i32) {
    %c0_i32 = arith.constant 0 : i32
    %c0_i32_0 = arith.constant 0 : i32
    %c0_i32_1 = arith.constant 0 : i32
    return %c0_i32, %c0_i32_0 : i32, i32
  }
  func.func @transform_2(%arg0: i32, %arg1: i32, %arg2: i32) -> (i32, i32) {
    %c0_i32 = arith.constant 0 : i32
    %c0_i32_0 = arith.constant 0 : i32
    %c0_i32_1 = arith.constant 0 : i32
    return %c0_i32, %c0_i32_0 : i32, i32
  }
  func.func @transform_3(%arg0: i32, %arg1: i32, %arg2: i32) -> (i32, i32) {
    %c0_i32 = arith.constant 0 : i32
    %c0_i32_0 = arith.constant 0 : i32
    %c0_i32_1 = arith.constant 0 : i32
    return %c0_i32, %c0_i32_0 : i32, i32
  }
  func.func @transform_4(%arg0: i32, %arg1: i32, %arg2: i32) -> (i32, i32) {
    %c0_i32 = arith.constant 0 : i32
    %c0_i32_0 = arith.constant 0 : i32
    %c0_i32_1 = arith.constant 0 : i32
    return %c0_i32, %c0_i32_0 : i32, i32
  }
  func.func @transform_5(%arg0: i32, %arg1: i32, %arg2: i32) -> (i32, i32) {
    %c0_i32 = arith.constant 0 : i32
    %c0_i32_0 = arith.constant 0 : i32
    %c0_i32_1 = arith.constant 0 : i32
    return %c0_i32, %c0_i32_0 : i32, i32
  }
  func.func @transform_6(%arg0: i32, %arg1: i32, %arg2: i32) -> (i32, i32) {
    %c0_i32 = arith.constant 0 : i32
    %c0_i32_0 = arith.constant 0 : i32
    %c0_i32_1 = arith.constant 0 : i32
    return %c0_i32, %c0_i32_0 : i32, i32
  }
  func.func @transform_7(%arg0: i32, %arg1: i32, %arg2: i32) -> (i32, i32) {
    %c0_i32 = arith.constant 0 : i32
    %c0_i32_0 = arith.constant 0 : i32
    %c0_i32_1 = arith.constant 0 : i32
    return %c0_i32, %c0_i32_0 : i32, i32
  }
  func.func @transform_8(%arg0: i32, %arg1: i32, %arg2: i32) -> (i32, i32) {
    %c0_i32 = arith.constant 0 : i32
    %c0_i32_0 = arith.constant 0 : i32
    %c0_i32_1 = arith.constant 0 : i32
    return %c0_i32, %c0_i32_0 : i32, i32
  }
  func.func @transform_9(%arg0: i32, %arg1: i32, %arg2: i32) -> (i32, i32) {
    %c0_i32 = arith.constant 0 : i32
    %c0_i32_0 = arith.constant 0 : i32
    %c0_i32_1 = arith.constant 0 : i32
    return %c0_i32, %c0_i32_0 : i32, i32
  }
  func.func @transform_10(%arg0: i32, %arg1: i32, %arg2: i32) -> (i32, i32) {
    %c0_i32 = arith.constant 0 : i32
    %c0_i32_0 = arith.constant 0 : i32
    %c0_i32_1 = arith.constant 0 : i32
    return %c0_i32, %c0_i32_0 : i32, i32
  }
  func.func @transform_11(%arg0: i32, %arg1: i32, %arg2: i32) -> (i32, i32, i32) {
    %0 = arith.muli %arg1, %arg2 : i32
    %c0_i32 = arith.constant 0 : i32
    %c0_i32_0 = arith.constant 0 : i32
    return %arg0, %0, %c0_i32 : i32, i32, i32
  }
}

</mosaic_0001>

<bundles_post_ra>
// kernel: tpu_custom_call.1
= control target key start
LH: loop header
LB: loop body
LE: loop exit
PB: predicated region body
PF: predicated region fallthrough
CT: control target
= control target key end

     0   :  { %s1992_s0 = inlined_call_operand.hbm [shape: f32[2,48,128], index: 0, kind: input, shape index: {}]   ;;  %s1993_s1 = inlined_call_operand.hbm [shape: f32[7,128], index: 1, kind: input, shape index: {}]   ;;  %s1994_s2 = inlined_call_operand.vmem [shape: f32[1,128], index: 2, kind: input, shape index: {}]   ;;  %s1995_s3 = inlined_call_operand.vmem [shape: f32[1,128], index: 3, kind: input, shape index: {}]   ;;  %s1996_s4 = inlined_call_operand.vmem [shape: f32[1,128], index: 4, kind: input, shape index: {}]   ;;  %s1997_s5 = inlined_call_operand.hbm [shape: bf16[128,128], index: 5, kind: input, shape index: {}]   ;;  %s1998_s6 = inlined_call_operand.vmem [shape: f32[1,128], index: 6, kind: input, shape index: {}]   ;;  %s1999_s7 = inlined_call_operand.vmem [shape: f32[1,128], index: 7, kind: input, shape index: {}]   ;;  %s2000_s8 = inlined_call_operand.vmem [shape: f32[1,128], index: 8, kind: input, shape index: {}]   ;;  %s2001_s9 = inlined_call_operand.hbm [shape: bf16[128,128], index: 9, kind: input, shape index: {}]   ;;  %s2002_s10 = inlined_call_operand.vmem [shape: f32[1,128], index: 10, kind: input, shape index: {}]   ;;  %s2003_s11 = inlined_call_operand.hbm [shape: f32[2,48,128], index: 11, kind: output, shape index: {}]  }
   0x1   :  { %2022 = sst [smem:[#allocation34_spill]] %s2000_s8 }
   0x2   :  { %2023 = sst [smem:[#allocation35_spill]] %s2002_s10 }
   0x3   :  { %2024 = sst [smem:[#allocation36_spill]] %s2003_s11 }
   0x4   :  { %16 = vsyncpa [#allocation8], 0 }
   0x5   :  { %17 = vsyncpa [#allocation11], 0 }
   0x6   :  { %18 = vsyncpa [#allocation9], 0 }
   0x7   :  { %20 = vsyncpa [#allocation9 + $0x1], 0  ;;  %s1665_s17 = smov 0   ;;  %s1667_s18 = smov 0  }
   0x8   :  { %s1669_s19 = smov 0   ;;  %s1671_s20 = smov 0  }
   0x9   :  { %s1673_s21 = smov 0   ;;  %s1675_s22 = smov 0  }
   0xa   :  { %s1677_s23 = smov 0   ;;  %s1679_s24 = smov 0  }
   0xb   :  { %s1681_s25 = smov 0   ;;  %s1683_s26 = smov 0  }
   0xc LB: > { %2025 = sst [smem:[#allocation22_spill]] %s1552_s17  ;;  %s1066_s27 = sadd.s32 4294967295, %s1588_s26   ;;  %s1588_s26 = sphi %s1683_s26, %s26_s26   ;;  %s1584_s25 = sphi %s1681_s25, %s2061_s25   ;;  %s1580_s24 = sphi %s1679_s24, %s2060_s24   ;;  %s1576_s23 = sphi %s1677_s23, %s2066_s23   ;;  %s1572_s22 = sphi %s1675_s22, %s2058_s22   ;;  %s1568_s21 = sphi %s1673_s21, %s2065_s21   ;;  %s1564_s20 = sphi %s1671_s20, %s2064_s20   ;;  %s1560_s19 = sphi %s1669_s19, %s2055_s19   ;;  %s1556_s18 = sphi %s1667_s18, %s2063_s18   ;;  %s1552_s17 = sphi %s1665_s17, %s2062_s17  }
   0xd   : > { %2026 = sst [smem:[#allocation23_spill]] %s1560_s19  ;;  %s1067_s28 = sadd.s32 4294967294, %s1588_s26  }
   0xe   : > { %2027 = sst [smem:[#allocation24_spill]] %s1576_s23  ;;  %s38_s29 = sadd.s32 1, %s1576_s23 }
   0xf   : > { %2028 = sst [smem:[#allocation25_spill]] %s1580_s24  ;;  %s41_s30 = sadd.s32 1, %s1580_s24 }
  0x10   : > { %2029 = sst [smem:[#allocation26_spill]] %s1584_s25  ;;  %p39_p0 = scmp.ge.s32.totalorder %s38_s29, 3 }
  0x11   : > { %2030 = sst [smem:[#allocation27_spill]] %s1588_s26  ;;  %s45_s12 = sadd.s32 1, %s1584_s25 }
  0x12   : > { %s259_s13 = smul.u32 %s1576_s23, %s1580_s24  ;;  %s266_s14 = sadd.s32 1, %s1560_s19 }
  0x13   : > { %s2068_s29 = smov (%p39_p0, %s38_s29), 0  ;;  %s2070_s30 = smov (!%p39_p0, %s41_s30), %s1580_s24 }
  0x14   : > { %2031 = sst [smem:[#allocation28_spill]] %s2068_s29  ;;  %p276_p1 = scmp.ne.s32.totalorder %s1560_s19, %s1556_s18 }
  0x15   : > { %p277_p2 = scmp.eq.s32.totalorder %s1066_s27, 11  ;;  %p43_p3 = scmp.ge.s32.totalorder %s2070_s30, 2 }
  0x16   : > { %p282_p4 = scmp.ne.s32.totalorder %s1556_s18, %s1552_s17  ;;  %p283_p6 = scmp.eq.s32.totalorder %s1067_s28, 11 }
  0x17   : > { %p1730_p5 = por %p277_p2, %p276_p1  ;;  %s2072_s30 = smov (%p43_p3, %s2070_s30), 0 }
  0x18   : > { %2034 = sst [smem:[#allocation30_spill]] %s2072_s30  ;;  %s2074_s12 = smov (!%p43_p3, %s45_s12), %s1584_s25 }
  0x19   : > { %s2032_s15 = scalar_select %p1730_p5, 1, 0 }
  0x1a   : > { %s260_s16 = smul.u32 %s2072_s30, %s2068_s29  ;;  %p1739_p7 = por %p283_p6, %p282_p4 }
  0x1b   : > { %2033 = sst [smem:[#allocation29_spill]] %s2032_s15  ;;  %p47_p8 = scmp.ge.s32.totalorder %s2074_s12, 2 }
  0x1c   : > { %s2035_s23 = scalar_select %p1739_p7, 1, 0 }
  0x1d   : > { %p1068_p9 = scmp.ge.s32.totalorder %s1588_s26, 1  ;;  %s262_s24 = ssub.s32 %s259_s13, %s260_s16 }
  0x1e   : > { %2036 = sst [smem:[#allocation31_spill]] %s2035_s23  ;;  %p290_p10 = scmp.lt.s32.totalorder %s1588_s26, 13 }
  0x1f   : > { %s2076_s12 = smov (%p47_p8, %s2074_s12), 0  ;;  %p1753_p12 = scmp.eq.s32.totalorder %s1066_s27, 0 }
  0x20   : > { %2037 = sst [smem:[#allocation32_spill]] %s2076_s12  ;;  %p1747_p11 = pnand %p1068_p9, %p290_p10 }
  0x21   : > { %s261_s28 = ssub.s32 %s1584_s25, %s2076_s12  ;;  %s1590_s16 = smov [#allocation10]  }
  0x22   : > { %s2038_s17 = scalar_select %p1747_p11, 1, 0 }
  0x23   : > { %s2039_s30 = scalar_select %p1753_p12, 1, 0 }
  0x24   : > { %s263_s29 = sor.u32 %s262_s24, %s261_s28  ;;  %p1218_p13 = pneg %p1747_p11 }
  0x25   : > { %p264_p0 = scmp.eq.s32.totalorder %s263_s29, 0  ;;  %s322_s23 = sshll.u32 %s1590_s16, 4  ;;  %s323_s23 = int_to_ptr.vmem [resolvable:$true] %s322_s23 }
  0x26   : > { %p1761_p1 = pnand %p1753_p12, %p1218_p13  ;;  %s1360_s25 = scalar_lea.hbm %s1997_s5, 1024 }
  0x27   : > { %s1766_s26 = scalar_select %p264_p0, %s1560_s19, %s266_s14  }
  0x28   : > { %p1361_p2 = scmp.ne.s32.totalorder %s1997_s5, %s1360_s25  ;;  %p1776_p3 = pneg %p1761_p1 }
  0x29   : > { %2041 = sst [smem:[#allocation33_spill]] %s1766_s26  ;;  %p1367_p8 = scmp.lt.u32.totalorder %s1360_s25, %s1997_s5 }
  0x2a   : > { %p1363_p4 = pnand %p1776_p3, %p1361_p2 }
  0x2c   : > { %p1364_p6 = pneg %p1363_p4 }
  0x2e   : > { %p1369_p9 = pnand %p1367_p8, %p1364_p6 }
  0x30   : > { %1372 = shalt.err (!%p1369_p9)
}
  0x31   : > { %s1373_s12 = scalar_lea.vmem %s323_s23, 1024  ;;  %p1381_p7 = scmp.lt.s32.totalorder %s323_s23, %s323_s23 }
  0x32   : > { %p1374_p10 = scmp.ne.s32.totalorder %s323_s23, %s1373_s12  ;;  %p1382_p5 = scmp.lt.s32.totalorder %s1373_s12, %s1373_s12 }
  0x34   : > { %p1376_p13 = pnand %p1374_p10, %p1776_p3  ;;  %p1383_p12 = por %p1382_p5, %p1381_p7 }
  0x36   : > { %p1377_p0 = pneg %p1376_p13 }
  0x38   : > { %p1384_p11 = pnand %p1383_p12, %p1377_p0 }
  0x3a   : > { %1387 = shalt.err (!%p1384_p11)
}
  0x3b   : > { %s1591_s11 = smov 64   ;;  %s1592_s16 = smov 4  }
  0x3c   : > { %1224 = dma.hbm_to_vmem [thread:$0]  (!%p1761_p1), %s1997_s5, 1024, %s323_s23, [#allocation11], %s1591_s11, %s1591_s11, %s1592_s16  }
  0x3d   : > { %s1593_s24 = smov [#allocation7]   ;;  %s1594_s28 = smov [#allocation12]  }
  0x3e   : > { %s303_s14 = sshll.u32 %s1593_s24, 4  ;;  %s344_s26 = sshll.u32 %s1594_s28, 4  ;;  %s304_s14 = int_to_ptr.vmem [resolvable:$true] %s303_s14  ;;  %s1795_s26 = int_to_ptr.vmem [resolvable:$true] %s344_s26 }
  0x3f   : > { %s1388_s15 = scalar_lea.hbm %s1993_s1, 128 }
  0x40   : > { %p1389_p5 = scmp.ne.s32.totalorder %s1993_s1, %s1388_s15  ;;  %p1395_p12 = scmp.lt.u32.totalorder %s1388_s15, %s1993_s1 }
  0x42   : > { %p1391_p7 = pnand %p1389_p5, %p1776_p3 }
  0x44   : > { %p1392_p11 = pneg %p1391_p7 }
  0x46   : > { %p1397_p2 = pnand %p1395_p12, %p1392_p11 }
  0x48   : > { %1400 = shalt.err (!%p1397_p2)
}
  0x49   : > { %s1401_s27 = scalar_lea.vmem %s304_s14, 128  ;;  %p1409_p9 = scmp.lt.s32.totalorder %s304_s14, %s304_s14 }
  0x4a   : > { %p1402_p4 = scmp.ne.s32.totalorder %s304_s14, %s1401_s27  ;;  %p1410_p10 = scmp.lt.s32.totalorder %s1401_s27, %s1401_s27 }
  0x4c   : > { %p1404_p6 = pnand %p1402_p4, %p1776_p3  ;;  %p1411_p13 = por %p1410_p10, %p1409_p9 }
  0x4e   : > { %p1405_p8 = pneg %p1404_p6 }
  0x50   : > { %p1412_p0 = pnand %p1411_p13, %p1405_p8 }
  0x52   : > { %1415 = shalt.err (!%p1412_p0)
}
  0x53   : > { %1221 = dma.hbm_to_vmem [thread:$0]  (!%p1761_p1), %s1993_s1, 128, %s304_s14, [#allocation8]  }
  0x54   : > { %s1416_s24 = scalar_lea.hbm %s2001_s9, 1024 }
  0x55   : > { %p1417_p5 = scmp.ne.s32.totalorder %s2001_s9, %s1416_s24  ;;  %p1423_p12 = scmp.lt.u32.totalorder %s1416_s24, %s2001_s9 }
  0x57   : > { %p1419_p7 = pnand %p1417_p5, %p1776_p3 }
  0x59   : > { %p1420_p11 = pneg %p1419_p7 }
  0x5b   : > { %p1425_p2 = pnand %p1423_p12, %p1420_p11 }
  0x5d   : > { %1428 = shalt.err (!%p1425_p2)
}
  0x5e   : > { %s1429_s14 = scalar_lea.vmem %s1795_s26, 1024  ;;  %p1437_p9 = scmp.lt.s32.totalorder %s1795_s26, %s1795_s26 }
  0x5f   : > { %p1430_p4 = scmp.ne.s32.totalorder %s1795_s26, %s1429_s14  ;;  %p1438_p10 = scmp.lt.s32.totalorder %s1429_s14, %s1429_s14 }
  0x61   : > { %p1432_p6 = pnand %p1430_p4, %p1776_p3  ;;  %p1439_p13 = por %p1438_p10, %p1437_p9 }
  0x63   : > { %p1433_p8 = pneg %p1432_p6 }
  0x65   : > { %p1440_p0 = pnand %p1439_p13, %p1433_p8 }
  0x67   : > { %1443 = shalt.err (!%p1440_p0)
}
  0x68   : > { %1227 = dma.hbm_to_vmem [thread:$0]  (!%p1761_p1), %s2001_s9, 1024, %s1795_s26, [#allocation11], %s1591_s11, %s1591_s11, %s1592_s16  }
  0x69   : > { %p2043_p5 = scmp.ne.s32.totalorder %s2038_s17, 0 }
  0x6a   : > { %p2044_p3 = scmp.ne.s32.totalorder (!%p2043_p5), %s2039_s30, 0 }
  0x6b   : > { %363 = sbr.rel (%p2043_p5) target bundleno = 1216 (0x4c0), region = 60 }
  0x72   : > { %1537 = dma.done.wait (%p2044_p3), [#allocation8], 128  }
  0x73   : > { %1539 = vsyncadd (%p2044_p3), [#allocation8], 4294967168 }
  0x74   : > { %1541 = dma.done.wait (%p2044_p3), [#allocation11], 2048  }
  0x75   : > { %1543 = vsyncadd (%p2044_p3), [#allocation11], 4294965248  ;;  %s401_s17 = sand.u32 1, %s1556_s18   ;;  %s1853_s26 = sshll.u32 %s1564_s20, 4 }
  0x76   : > { %s1076_s13 = sshll.u32 %s401_s17, 4  ;;  %p408_p1 = scmp.eq.s32.totalorder %s1568_s21, 0 }
  0x77   : > { %p409_p7 = scmp.eq.s32.totalorder %s1564_s20, 0  ;;  %s1861_s29 = scalar_lea.vmem [#allocation13], %s1076_s13 }
  0x79   : > { %p410_p11 = pnand %p409_p7, %p408_p1 }
  0x7a   : > { %s1144_s30 = smul.u32 (!%p410_p11), 768, %s1572_s22  ;;  %s1595_s11 = smov (!%p410_p11), [#allocation2 + $0x8]   ;;  %v1596_v0 = vmov (!%p410_p11), 0.0  }
  0x7b   : > { %413 = sbr.rel (%p410_p11) target bundleno = 149 (0x95), region = 76  ;;  %s425_s16 = sshll.u32 (!%p410_p11), %s1595_s11, 4  ;;  %429 = vst [vmem:[#allocation4] sm:$0x1] (!%p410_p11), %v1596_v0  ;;  %s426_s16 = int_to_ptr.vmem [resolvable:$true] %s425_s16 }
  0x7c   : > { %s416_s15 = scalar_lea.hbm (!%p410_p11), %s1992_s0, %s1144_s30  ;;  %s1446_s25 = scalar_lea.hbm (!%p410_p11), %s1992_s0, 1536 }
  0x7d   : > { %s1444_s24 = scalar_lea.hbm (!%p410_p11), %s416_s15, 768  ;;  %p1447_p2 = scmp.lt.u32.totalorder (!%p410_p11), %s416_s15, %s1992_s0 }
  0x7e   : > { %p1445_p12 = scmp.ne.s32.totalorder (!%p410_p11), %s416_s15, %s1444_s24  ;;  %p1448_p4 = scmp.lt.u32.totalorder (!%p410_p11), %s1446_s25, %s1444_s24 }
  0x7f   : > { %p1450_p8 = scmp.lt.u32.totalorder (!%p410_p11), %s1444_s24, %s416_s15 }
  0x80   : > { %p1449_p6 = por (!%p410_p11), %p1448_p4, %p1447_p2 }
  0x82   : > { %p1451_p9 = por %p1450_p8, %p1449_p6 }
  0x84   : > { %p1452_p10 = pnand %p1451_p9, %p1445_p12 }
  0x86   : > { %1455 = shalt.err (!%p1452_p10)  }
  0x87   : > { %s1456_s27 = scalar_lea.vmem %s426_s16, 768  ;;  %s1597_s8 = smov [#allocation2]  }
  0x88   : > { %p1457_p13 = scmp.ne.s32.totalorder %s426_s16, %s1456_s27  ;;  %s1458_s13 = sshll.u32 %s1597_s8, 4  ;;  %s1459_s13 = int_to_ptr.vmem [resolvable:$false] %s1458_s13 }
  0x89   : > { %s1460_s30 = scalar_lea.vmem %s1459_s13, 1024  ;;  %p1461_p0 = scmp.lt.s32.totalorder %s426_s16, %s1459_s13 }
  0x8a   : > { %p1462_p5 = scmp.lt.s32.totalorder %s1460_s30, %s1456_s27 }
  0x8c   : > { %p1463_p3 = por %p1462_p5, %p1461_p0 }
  0x8e   : > { %p1464_p1 = pnand %p1463_p3, %p1457_p13 }
  0x90   : > { %1467 = shalt.err (!%p1464_p1)  }
  0x91   : > { %428 = dma.hbm_to_vmem [thread:$0]  %s416_s15, 768, %s426_s16, [#allocation6] }
  0x92   : > { %1544 = dma.done.wait [#allocation6], 768 }
  0x93   : > { %1545 = vsyncadd [#allocation6], 4294966528  ;;  %433 = vst [vmem:[#allocation2] sm:$0xff] %v1596_v0 }
  0x94   : > { %434 = vst [vmem:[#allocation2 + $0x38] sm:$0xff] %v1596_v0 }
  0x95 PF: > { %p1079_p11 = scmp.ne.s32.totalorder %s1568_s21, 0 }
  0x96   : > { %v1083_v1 = vld [vmem:[#allocation7] ss:$0 sm:$0xff] (!%p1079_p11)  ;;  %v1087_v2 = vld [vmem:[#allocation7 + $0x1] ss:$0 sm:$0xff] (!%p1079_p11)  ;;  %s1875_s11 = scalar_lea.vmem (!%p1079_p11), [#allocation2], %s1853_s26  ;;  %v1332_v51 = vld [vmem:[#allocation10] sm:$0xff] (!%p1079_p11)   ;;  %v544_v53 = vlaneseq (!%p1079_p11) }
  0x97   : > { %437 = sbr.rel (%p1079_p11) target bundleno = 751 (0x2ef), region = 84  ;;  %v1091_v8 = vld [vmem:[#allocation7 + $0x2] ss:$0 sm:$0xff] (!%p1079_p11)  ;;  %v1095_v10 = vld [vmem:[#allocation7 + $0x3] ss:$0 sm:$0xff] (!%p1079_p11)  ;;  %v1598_v52 = vmov (!%p1079_p11), 0.0  }
  0x98   : > { %v1099_v13 = vld [vmem:[#allocation7 + $0x4] ss:$0 sm:$0xff] (!%p1079_p11)  ;;  %v1103_v17 = vld [vmem:[#allocation7 + $0x5] ss:$0 sm:$0xff] (!%p1079_p11)  ;;  %v1107_v23 = vld [vmem:[#allocation7 + $0x6] ss:$0 sm:$0xff] (!%p1079_p11)  ;;  %1163 = vmatprep.subr.bf16.mxu0 (!%p1079_p11), %v1598_v52 }
  0x99   : > { %v1108_v43 = vld [vmem:[%s1994_s2] ss:$0 sm:$0xff] (!%p1079_p11)  ;;  %1164 = vmatpush3.bf16.msra.mxu0 (!%p1079_p11), %v1332_v51  ;;  %v545_v54 = vand.u32 (!%p1079_p11), 127, %v544_v53  ;;  %vm1599_vm1 = vmmov (!%p1079_p11), 0   ;;  %s713_s23 = sshra.s32 (!%p1079_p11), %s1853_s26, 4 }
  0x9a   : > { %1165 = vmatprep.subr.bf16.mxu0 (!%p1079_p11), %v1598_v52  ;;  %1179 = vmatprep.mubr.msk.bf16.mxu0 (!%p1079_p11), %vm1599_vm1, %v1598_v52  ;;  %s1120_s14 = sshll.u32 (!%p1079_p11), %s713_s23, 3 }
  0x9b   : > { %v1081_v3 = vld [vmem:[%s1875_s11 + $0x5] sm:$0xff] (!%p1079_p11)  ;;  %v1082_v19 = vld [vmem:[%s1875_s11 + $0xd] sm:$0xff] (!%p1079_p11)  ;;  %vm546_vm0 = vcmp.lt.s32.totalorder (!%p1079_p11), %v545_v54, 32  ;;  %s716_s27 = scalar_lea.vmem (!%p1079_p11), [#allocation3], %s1120_s14 }
  0x9c   : > { %v1085_v4 = vld [vmem:[%s1875_s11 + $0x6] sm:$0xff] (!%p1079_p11)  ;;  %v447_v6 = vmul.f32 (!%p1079_p11), %v1083_v1, %v1081_v3  ;;  %v1086_v20 = vld [vmem:[%s1875_s11 + $0xe] sm:$0xff] (!%p1079_p11)  ;;  %v448_v24 = vmul.f32 (!%p1079_p11), %v1083_v1, %v1082_v19  ;;  %v1335_v3 = vld [vmem:[#allocation10 + $0x18] sm:$0xff] (!%p1079_p11)  }
  0x9d   : > { %v1089_v5 = vld [vmem:[%s1875_s11 + $0x7] sm:$0xff] (!%p1079_p11)  ;;  %v458_v7 = vmul.f32 (!%p1079_p11), %v1087_v2, %v1085_v4  ;;  %v459_v25 = vmul.f32 (!%p1079_p11), %v1087_v2, %v1086_v20  ;;  %v1090_v26 = vld [vmem:[%s1875_s11 + $0xf] sm:$0xff] (!%p1079_p11)  ;;  %v1110_v20 = vld [vmem:[%s1996_s4] ss:$0 sm:$0xff] (!%p1079_p11) }
  0x9e   : > { %v1093_v9 = vld [vmem:[%s1875_s11 + $0x8] sm:$0xff]  ;;  %v471_v11 = vmul.f32 %v1091_v8, %v1089_v5  ;;  %v1094_v27 = vld [vmem:[%s1875_s11 + $0x10] sm:$0xff]  ;;  %v472_v28 = vmul.f32 %v1091_v8, %v1090_v26 }
  0x9f   : > { %v1097_v12 = vld [vmem:[%s1875_s11 + $0x9] sm:$0xff]  ;;  %v460_v14 = vadd.f32 %v458_v7, %v447_v6  ;;  %v484_v15 = vmul.f32 %v1095_v10, %v1093_v9  ;;  %v1098_v29 = vld [vmem:[%s1875_s11 + $0x11] sm:$0xff]  ;;  %v461_v33 = vadd.f32 %v459_v25, %v448_v24  ;;  %v485_v34 = vmul.f32 %v1095_v10, %v1094_v27  ;;  %v1339_v7 = vld [vmem:[#allocation10 + $0x38] sm:$0xff]  }
  0xa0   : > { %v1101_v16 = vld [vmem:[%s1875_s11 + $0xa] sm:$0xff]  ;;  %v497_v22 = vmul.f32 %v1099_v13, %v1097_v12  ;;  %v1102_v30 = vld [vmem:[%s1875_s11 + $0x12] sm:$0xff]  ;;  %v498_v39 = vmul.f32 %v1099_v13, %v1098_v29  ;;  %v1336_v4 = vld [vmem:[#allocation10 + $0x20] sm:$0xff]  }
  0xa1   : > { %v1105_v18 = vld [vmem:[%s1875_s11 + $0xb] sm:$0xff]  ;;  %v473_v21 = vadd.f32 %v471_v11, %v460_v14  ;;  %v510_v32 = vmul.f32 %v1103_v17, %v1101_v16  ;;  %v1106_v35 = vld [vmem:[%s1875_s11 + $0x13] sm:$0xff]  ;;  %v474_v38 = vadd.f32 %v472_v28, %v461_v33  ;;  %v511_v42 = vmul.f32 %v1103_v17, %v1102_v30  ;;  %v1109_v16 = vld [vmem:[%s1995_s3] ss:$0 sm:$0xff] }
  0xa2   : > { %v523_v37 = vmul.f32 %v1107_v23, %v1105_v18  ;;  %v524_v46 = vmul.f32 %v1107_v23, %v1106_v35  ;;  %v1333_v1 = vld [vmem:[#allocation10 + $0x8] sm:$0xff]   ;;  %v1334_v2 = vld [vmem:[#allocation10 + $0x10] sm:$0xff]   ;;  %v1111_v25 = vld [vmem:[%s1998_s6] ss:$0 sm:$0xff] }
  0xa3   : > { %v486_v31 = vadd.f32 %v484_v15, %v473_v21  ;;  %v487_v41 = vadd.f32 %v485_v34, %v474_v38  ;;  %1166 = vmatpush3.bf16.msra.mxu0 %v1333_v1  ;;  %v1337_v5 = vld [vmem:[#allocation10 + $0x28] sm:$0xff]   ;;  %v1338_v6 = vld [vmem:[#allocation10 + $0x30] sm:$0xff]  }
  0xa4   : > { %1167 = vmatprep.subr.bf16.mxu0 %v1598_v52 }
  0xa5   : > { %v499_v36 = vadd.f32 %v497_v22, %v486_v31  ;;  %v500_v45 = vadd.f32 %v498_v39, %v487_v41 }
  0xa7   : > { %v512_v40 = vadd.f32 %v510_v32, %v499_v36  ;;  %v513_v48 = vadd.f32 %v511_v42, %v500_v45  ;;  %1168 = vmatpush3.bf16.msra.mxu0 %v1334_v2 }
  0xa8   : > { %1169 = vmatprep.subr.bf16.mxu0 %v1598_v52 }
  0xa9   : > { %v525_v44 = vadd.f32 %v523_v37, %v512_v40  ;;  %v526_v49 = vadd.f32 %v524_v46, %v513_v48 }
  0xab   : > { %v534_v47 = vadd.f32 %v1108_v43, %v525_v44  ;;  %v535_v50 = vadd.f32 %v1108_v43, %v526_v49  ;;  %1170 = vmatpush3.bf16.msra.mxu0 %v1335_v3 }
  0xac   : > { %1171 = vmatprep.subr.bf16.mxu0 %v1598_v52 }
  0xad   : > { %536 = vadd.xlane.f32.xlu0 %v534_v47 }
  0xaf   : > { %1172 = vmatpush3.bf16.msra.mxu0 %v1336_v4 }
  0xb0   : > { %1173 = vmatprep.subr.bf16.mxu0 %v1598_v52 }
  0xb1   : > { %538 = vadd.xlane.f32.xlu0 %v535_v50 }
  0xb3   : > { %1174 = vmatpush3.bf16.msra.mxu0 %v1337_v5 }
  0xb4   : > { %1175 = vmatprep.subr.bf16.mxu0 %v1598_v52 }
  0xb7   : > { %1176 = vmatpush3.bf16.msra.mxu0 %v1338_v6 }
  0xb8   : > { %1177 = vmatprep.subr.bf16.mxu0 %v1598_v52 }
  0xbb   : > { %1178 = vmatpush3.bf16.msra.mxu0 %v1339_v7 }
 0x13a   : > { %v537_v55 = vpop.xlane.xlu0 %536 }
 0x13b   : > { %v540_v56 = vmul.f32 0.03125, %v537_v55 }
 0x13d   : > { %v542_v57 = vsub.f32 %v534_v47, %v540_v56 }
 0x13e   : > { %v539_v58 = vpop.xlane.xlu0 %538 }
 0x13f   : > { %v541_v59 = vmul.f32 0.03125, %v539_v58  ;;  %v547_v60 = vsel %vm546_vm0, %v542_v57, 0.0 }
 0x140   : > { %v549_v61 = vmul.f32 %v547_v60, %v547_v60 }
 0x141   : > { %v543_v62 = vsub.f32 %v535_v50, %v541_v59  ;;  %v718_v59 = vld [vmem:[#allocation4] sm:$0x1] }
 0x142   : > { %551 = vadd.xlane.f32.xlu1 %v549_v61 }
 0x143   : > { %v548_v63 = vsel %vm546_vm0, %v543_v62, 0.0 }
 0x144   : > { %v550_v0 = vmul.f32 %v548_v63, %v548_v63 }
 0x146   : > { %553 = vadd.xlane.f32.xlu1 %v550_v0 }
 0x1cf   : > { %v552_v8 = vpop.xlane.xlu1 %551 }
 0x1d0   : > { %v555_v9 = vmul.f32 0.03125, %v552_v8 }
 0x1d2   : > { %v557_v10 = vadd.f32 1e-06, %v555_v9 }
 0x1d3   : > { %v554_v11 = vpop.xlane.xlu1 %553 }
 0x1d4   : > { %1340 = vrsqrt.f32 %v557_v10  ;;  %v556_v12 = vmul.f32 0.03125, %v554_v11 }
 0x1d6   : > { %v558_v13 = vadd.f32 1e-06, %v556_v12 }
 0x1d8   : > { %1342 = vrsqrt.f32 %v558_v13 }
 0x1de   : > { %v1341_v14 = vpop.eup %1340 }
 0x1df   : > { %v561_v15 = vmul.f32 %v1341_v14, %v542_v57 }
 0x1e1   : > { %v570_v19 = vmul.f32 %v1109_v16, %v561_v15 }
 0x1e2   : > { %v1343_v17 = vpop.eup %1342 }
 0x1e3   : > { %v562_v18 = vmul.f32 %v1343_v17, %v543_v62  ;;  %v579_v22 = vadd.f32 %v1110_v20, %v570_v19 }
 0x1e5   : > { %v571_v21 = vmul.f32 %v1109_v16, %v562_v18 }
 0x1e7   : > { %v580_v23 = vadd.f32 %v1110_v20, %v571_v21 }
 0x1e9   : > { %v581_v24 = vpack.c.bf16 %v580_v23, %v579_v22 }
 0x1eb   : > { %1180 = vmatmul.mubr.bf16.vlgmr.msra.gmra.mrb[0].mxu0 %v581_v24 }
 0x2be   : > { %v687_v26 = vpop.f32.mrb[0].mxu0 }
 0x2bf   : > { %v688_v27 = vadd.f32 %v1111_v25, %v687_v26  ;;  %v1181_v28 = vpop.f32.mrb[1].mxu0 }
 0x2c0   : > { %v690_v29 = vpop.f32.mrb[2].mxu0 }
 0x2c1   : > { %v696_v30 = vmul.f32 %v688_v27, %v688_v27  ;;  %v691_v31 = vadd.f32 %v1111_v25, %v690_v29  ;;  %v1182_v32 = vpop.f32.mrb[3].mxu0  ;;  %v694_v43 = vmul.f32 0.5, %v688_v27 }
 0x2c3   : > { %v698_v33 = vmul.f32 %v696_v30, %v688_v27  ;;  %v697_v34 = vmul.f32 %v691_v31, %v691_v31  ;;  %v695_v47 = vmul.f32 0.5, %v691_v31 }
 0x2c5   : > { %v700_v35 = vmul.f32 0.044715, %v698_v33  ;;  %v699_v36 = vmul.f32 %v697_v34, %v691_v31 }
 0x2c7   : > { %v702_v37 = vadd.f32 %v700_v35, %v688_v27  ;;  %v701_v38 = vmul.f32 0.044715, %v699_v36 }
 0x2c9   : > { %v704_v39 = vmul.f32 0.7978846, %v702_v37  ;;  %v703_v40 = vadd.f32 %v701_v38, %v691_v31 }
 0x2cb   : > { %1344 = vtanh.f32 %v704_v39  ;;  %v705_v41 = vmul.f32 0.7978846, %v703_v40 }
 0x2cd   : > { %1346 = vtanh.f32 %v705_v41 }
 0x2d5   : > { %v1345_v42 = vpop.eup %1344 }
 0x2d6   : > { %v708_v44 = vadd.f32 1.0, %v1345_v42 }
 0x2d7   : > { %v1347_v45 = vpop.eup %1346 }
 0x2d8   : > { %v710_v46 = vmul.f32 %v708_v44, %v694_v43  ;;  %v709_v48 = vadd.f32 1.0, %v1347_v45 }
 0x2da   : > { %v711_v49 = vmul.f32 %v709_v48, %v695_v47  ;;  %v719_v50 = vmul.f32 %v710_v46, %v710_v46 }
 0x2dc   : > { %v712_v51 = vpack.c.bf16 %v711_v49, %v710_v46  ;;  %v720_v52 = vmul.f32 %v711_v49, %v711_v49 }
 0x2de   : > { %717 = vst [vmem:[%s716_s27] sm:$0xff] %v712_v51  ;;  %v721_v53 = vadd.f32 %v720_v52, %v719_v50 }
 0x2e0   : > { %v722_v54 = vrot.slane %v721_v53, 4 }
 0x2e2   : > { %v723_v55 = vadd.f32 %v722_v54, %v721_v53 }
 0x2e4   : > { %v724_v56 = vrot.slane %v723_v55, 2 }
 0x2e6   : > { %v725_v57 = vadd.f32 %v724_v56, %v723_v55 }
 0x2e8   : > { %v726_v58 = vrot.slane %v725_v57, 1 }
 0x2ea   : > { %v727_v60 = vadd.f32 %v726_v58, %v725_v57 }
 0x2ec   : > { %v728_v61 = vadd.f32 %v727_v60, %v718_v59 }
 0x2ee   : > { %729 = vst [vmem:[#allocation4] sm:$0x1] %v728_v61 }
 0x2ef PF: > { %p730_p12 = scmp.eq.s32.totalorder %s1568_s21, 1 }
 0x2f1   : > { %p731_p2 = pnand %p730_p12, %p409_p7 }
 0x2f2   : > { %vm743_vm4 = vcmask (!%p731_p2), 1040384  }
 0x2f3   : > { %734 = sbr.rel (%p731_p2) target bundleno = 934 (0x3a6), region = 88 }
 0x2f5   : > { %v735_v62 = vld [vmem:[#allocation4] sm:$0x1] (!%p731_p2) }
 0x2f6   : > { %1348 = vrsqrt.f32 (!%p731_p2), %v735_v62  ;;  %vm738_vm2 = vcmp.eq.f32.partialorder (!%p731_p2), %v735_v62, inf  ;;  %v741_v0 = vand.u32 (!%p731_p2), 2147483648, %v735_v62  ;;  %vm740_vm3 = vcmp.eq.f32.partialorder (!%p731_p2), %v735_v62, 0.0 }
 0x300   : > { %v1349_v63 = vpop.eup %1348 }
 0x301   : > { %v737_v1 = vmul.f32 %v1349_v63, %v735_v62 }
 0x303   : > { %v739_v2 = vsel %vm738_vm2, %v735_v62, %v737_v1 }
 0x304   : > { %v742_v3 = vsel %vm740_vm3, %v741_v0, %v739_v2 }
 0x305   : > { %v744_v4 = vsel %vm743_vm4, %v742_v3, 0.0 }
 0x306   : > { %745 = vadd.xlane.f32.xlu0 %v744_v4 }
 0x393   : > { %v746_v5 = vpop.xlane.xlu0 %745 }
 0x394   : > { %v747_v6 = vmul.f32 0.015625, %v746_v5 }
 0x396   : > { %v748_v7 = vadd.f32 1e-06, %v747_v6 }
 0x398   : > { %1350 = vrcp.f32 %v748_v7 }
 0x3a2   : > { %v1351_v8 = vpop.eup %1350 }
 0x3a3   : > { %v750_v9 = vmul.f32 %v1351_v8, %v742_v3 }
 0x3a5   : > { %751 = vst [vmem:[#allocation5] sm:$0x1] %v750_v9 }
 0x3a6 PF: > { %p1121_p7 = scmp.ne.s32.totalorder %s1568_s21, 1 }
 0x3a7   : > { %v1352_v10 = vld [vmem:[#allocation12] sm:$0xff] (!%p1121_p7)   ;;  %v1600_v11 = vmov (!%p1121_p7), 0.0   ;;  %v1353_v12 = vld [vmem:[#allocation12 + $0x8] sm:$0xff] (!%p1121_p7)   ;;  %vm1601_vm5 = vmmov (!%p1121_p7), 0   ;;  %s755_s8 = sshra.s32 (!%p1121_p7), %s1853_s26, 4  ;;  %v1354_v13 = vld [vmem:[#allocation12 + $0x10] sm:$0xff] (!%p1121_p7)  }
 0x3a8   : > { %754 = sbr.rel (%p1121_p7) target bundleno = 1187 (0x4a3), region = 92  ;;  %1183 = vmatprep.subr.bf16.mxu0 (!%p1121_p7), %v1600_v11  ;;  %1199 = vmatprep.mubr.msk.bf16.mxu0 (!%p1121_p7), %vm1601_vm5, %v1600_v11  ;;  %s1122_s13 = sshll.u32 (!%p1121_p7), %s755_s8, 3  ;;  %v1355_v17 = vld [vmem:[#allocation12 + $0x18] sm:$0xff] (!%p1121_p7)   ;;  %v1356_v21 = vld [vmem:[#allocation12 + $0x20] sm:$0xff] (!%p1121_p7)   ;;  %v1357_v25 = vld [vmem:[#allocation12 + $0x28] sm:$0xff] (!%p1121_p7)  }
 0x3a9   : > { %1184 = vmatpush3.bf16.msra.mxu0 (!%p1121_p7), %v1352_v10  ;;  %s758_s30 = scalar_lea.vmem (!%p1121_p7), [#allocation3], %s1122_s13  ;;  %v1124_v22 = vld [vmem:[%s1999_s7] ss:$0 sm:$0xff] (!%p1121_p7)  ;;  %s2045_s15 = sld [smem:[#allocation34_spill]] (!%p1121_p7)  ;;  %v1358_v29 = vld [vmem:[#allocation12 + $0x30] sm:$0xff] (!%p1121_p7)  }
 0x3aa   : > { %1185 = vmatprep.subr.bf16.mxu0 (!%p1121_p7), %v1600_v11  ;;  %v759_v14 = vld [vmem:[%s758_s30] sm:$0xff] (!%p1121_p7)  ;;  %s2046_s12 = sld [smem:[#allocation35_spill]] (!%p1121_p7)  ;;  %s994_s25 = scalar_lea.vmem (!%p1121_p7), [#allocation2], %s1853_s26 }
 0x3ab   : > { %v760_v15 = vunpack.c.l.bf16 (!%p1121_p7), %v759_v14  ;;  %v761_v16 = vunpack.c.h.bf16 (!%p1121_p7), %v759_v14  ;;  %v1359_v32 = vld [vmem:[#allocation12 + $0x38] sm:$0xff] (!%p1121_p7)   ;;  %v1136_v36 = vld [vmem:[%s994_s25 + $0x8] sm:$0xff] (!%p1121_p7)  ;;  %v1137_v40 = vld [vmem:[%s994_s25 + $0x10] sm:$0xff] (!%p1121_p7) }
 0x3ac   : > { %v1123_v18 = vld [vmem:[#allocation5] ss:$0 sm:$0xff] (!%p1121_p7) }
 0x3ad   : > { %1186 = vmatpush3.bf16.msra.mxu0 (!%p1121_p7), %v1353_v12  ;;  %v770_v19 = vmul.f32 (!%p1121_p7), %v1123_v18, %v760_v15  ;;  %v771_v20 = vmul.f32 (!%p1121_p7), %v1123_v18, %v761_v16 }
 0x3ae   : > { %1187 = vmatprep.subr.bf16.mxu0 (!%p1121_p7), %v1600_v11 }
 0x3af   : > { %v778_v23 = vmul.f32 %v1124_v22, %v770_v19  ;;  %v779_v24 = vmul.f32 %v1124_v22, %v771_v20  ;;  %v1125_v26 = vld [vmem:[%s2045_s15] ss:$0 sm:$0xff] }
 0x3b0   : > { %v1126_v34 = vld [vmem:[%s2046_s12] ss:$0 sm:$0xff] }
 0x3b1   : > { %1188 = vmatpush3.bf16.msra.mxu0 %v1354_v13  ;;  %v787_v27 = vadd.f32 %v1125_v26, %v778_v23  ;;  %v788_v28 = vadd.f32 %v1125_v26, %v779_v24 }
 0x3b2   : > { %1189 = vmatprep.subr.bf16.mxu0 %v1600_v11 }
 0x3b3   : > { %v789_v30 = vadd.f32 %v787_v27, %v760_v15  ;;  %v790_v31 = vadd.f32 %v788_v28, %v761_v16 }
 0x3b5   : > { %1190 = vmatpush3.bf16.msra.mxu0 %v1355_v17  ;;  %v791_v33 = vpack.c.bf16 %v790_v31, %v789_v30 }
 0x3b6   : > { %1191 = vmatprep.subr.bf16.mxu0 %v1600_v11 }
 0x3b9   : > { %1192 = vmatpush3.bf16.msra.mxu0 %v1356_v21 }
 0x3ba   : > { %1193 = vmatprep.subr.bf16.mxu0 %v1600_v11 }
 0x3bd   : > { %1194 = vmatpush3.bf16.msra.mxu0 %v1357_v25 }
 0x3be   : > { %1195 = vmatprep.subr.bf16.mxu0 %v1600_v11 }
 0x3c1   : > { %1196 = vmatpush3.bf16.msra.mxu0 %v1358_v29 }
 0x3c2   : > { %1197 = vmatprep.subr.bf16.mxu0 %v1600_v11 }
 0x3c5   : > { %1198 = vmatpush3.bf16.msra.mxu0 %v1359_v32 }
 0x3c8   : > { %1200 = vmatmul.mubr.bf16.vlgmr.msra.gmra.mrb[0].mxu0 %v791_v33 }
 0x49b   : > { %v897_v35 = vpop.f32.mrb[0].mxu0 }
 0x49c   : > { %v898_v37 = vadd.f32 %v1126_v34, %v897_v35  ;;  %v1201_v38 = vpop.f32.mrb[1].mxu0 }
 0x49d   : > { %v900_v39 = vpop.f32.mrb[2].mxu0 }
 0x49e   : > { %v908_v41 = vadd.f32 %v1136_v36, %v898_v37  ;;  %v901_v42 = vadd.f32 %v1126_v34, %v900_v39  ;;  %v1202_v43 = vpop.f32.mrb[3].mxu0 }
 0x4a0   : > { %910 = vst [vmem:[%s1861_s29] sm:$0xff] %v908_v41  ;;  %v909_v44 = vadd.f32 %v1137_v40, %v901_v42 }
 0x4a2   : > { %911 = vst [vmem:[%s1861_s29 + $0x8] sm:$0xff] %v909_v44 }
 0x4a3 PF: > { %s2047_s23 = sld [smem:[#allocation29_spill]]  ;;  %s920_s14 = smul.u32 %s1564_s20, %s1568_s21 }
 0x4a4   : > { %s1203_s26 = smul.u32 6, %s1572_s22  ;;  %s929_s27 = sshll.u32 %s1861_s29, 4  ;;  %s1925_s27 = int_to_ptr.vmem [resolvable:$true] %s929_s27 }
 0x4a5   : > { %s1139_s8 = sshll.u32 %s920_s14, 1  ;;  %s2048_s10 = sld [smem:[#allocation36_spill]] }
 0x4a6   : > { %s926_s13 = sadd.s32 %s1203_s26, %s1139_s8  ;;  %s1934_s15 = scalar_lea.sflag [#allocation9], %s401_s17 }
 0x4a7   : > { %s1140_s30 = sshll.u32 %s926_s13, 7  ;;  %s1468_s24 = scalar_lea.vmem %s1925_s27, 256 }
 0x4a8   : > { %p1469_p4 = scmp.ne.s32.totalorder %s1925_s27, %s1468_s24  ;;  %s1602_s20 = smov [#allocation13]  }
 0x4a9   : > { %p2049_p6 = scmp.ne.s32.totalorder %s2047_s23, 0  ;;  %s1472_s21 = sshll.u32 %s1602_s20, 4  ;;  %s1473_s21 = int_to_ptr.vmem [resolvable:$false] %s1472_s21 }
 0x4aa   : > { %s1474_s22 = scalar_lea.vmem %s1473_s21, 512  ;;  %p1475_p10 = scmp.lt.s32.totalorder %s1925_s27, %s1473_s21 }
 0x4ab   : > { %s1930_s19 = scalar_lea.hbm %s2048_s10, %s1140_s30  ;;  %p1470_p8 = pnand %p1469_p4, %p2049_p6 }
 0x4ac   : > { %p1476_p13 = scmp.lt.s32.totalorder %s1474_s22, %s1468_s24 }
 0x4ad   : > { %p1471_p9 = pneg %p1470_p8 }
 0x4ae   : > { %p1477_p0 = por %p1476_p13, %p1475_p10 }
 0x4b0   : > { %p1478_p5 = pnand %p1477_p0, %p1471_p9 }
 0x4b2   : > { %1481 = shalt.err (!%p1478_p5)
}
 0x4b3   : > { %s1482_s17 = scalar_lea.hbm %s1930_s19, 256  ;;  %s1486_s12 = scalar_lea.hbm %s2048_s10, 1536 }
 0x4b4   : > { %p1483_p3 = scmp.ne.s32.totalorder %s1930_s19, %s1482_s17  ;;  %p1487_p12 = scmp.lt.u32.totalorder %s1930_s19, %s2048_s10 }
 0x4b5   : > { %p1488_p2 = scmp.lt.u32.totalorder %s1486_s12, %s1482_s17  ;;  %p1490_p4 = scmp.lt.u32.totalorder %s1482_s17, %s1930_s19 }
 0x4b6   : > { %p1484_p1 = pnand %p1483_p3, %p2049_p6 }
 0x4b7   : > { %p1489_p7 = por %p1488_p2, %p1487_p12 }
 0x4b8   : > { %p1485_p11 = pneg %p1484_p1 }
 0x4b9   : > { %p1491_p8 = por %p1490_p4, %p1489_p7 }
 0x4bb   : > { %p1492_p9 = pnand %p1491_p8, %p1485_p11 }
 0x4bd   : > { %1495 = shalt.err (!%p1492_p9)
}
 0x4be   : > { %s1603_s26 = smov 128   ;;  %s1604_s8 = smov 8  }
 0x4bf   : > { %1216 = dma.vmem_to_hbm [thread:$0]  (%p2049_p6), %s1925_s27, 256, %s1930_s19, %s1934_s15, %s1603_s26, %s1603_s26, %s1604_s8  }
 0x4c0 PF: > { %s2050_s13 = sld [smem:[#allocation27_spill]]  ;;  %s2051_s30 = sld [smem:[#allocation22_spill]] }
 0x4c1   : > { %s2052_s11 = sld [smem:[#allocation31_spill]] }
 0x4c6   : > { %p1238_p10 = scmp.ge.s32.totalorder %s2050_s13, 2  ;;  %s944_s16 = sand.u32 1, %s2051_s30  }
 0x4c7   : > { %p2053_p13 = scmp.ne.s32.totalorder %s2052_s11, 0  ;;  %s945_s24 = scalar_lea.sflag [#allocation9], %s944_s16 }
 0x4c9   : > { %p1229_p0 = pnand %p1238_p10, %p2053_p13 }
 0x4cb   : > { %1547 = dma.done.wait (!%p1229_p0), %s945_s24, 256  }
 0x4cc   : > { %1549 = vsyncadd (!%p1229_p0), %s945_s24, 4294967040  ;;  %s26_s26 = sadd.s32 1, %s2050_s13   ;;  %s2054_s20 = sld [smem:[#allocation23_spill]] }
 0x4cd   : > { %p23_p5 = scmp.ge.s32.totalorder %s26_s26, 14   ;;  %s2055_s19 = sld [smem:[#allocation33_spill]] }
 0x4ce   : > { %s2056_s21 = sld [smem:[#allocation24_spill]]  ;;  %s2057_s23 = sld [smem:[#allocation25_spill]] }
 0x4cf   : > { %s2058_s22 = sld [smem:[#allocation26_spill]]  ;;  %s2059_s27 = sld [smem:[#allocation28_spill]] }
 0x4d0   : > { %s2060_s24 = sld [smem:[#allocation30_spill]]  ;;  %s2061_s25 = sld [smem:[#allocation32_spill]] }
 0x4d1   : > { %s2062_s17 = smov %s1556_s18  ;;  %25 = sbr.rel (!%p23_p5) target bundleno = 12 (0xc), region = 137 }
 0x4d2   : > { %s2063_s18 = smov %s2054_s20 }
 0x4d4   : > { %s2064_s20 = smov %s2056_s21  ;;  %s2065_s21 = smov %s2057_s23 }
 0x4d5   : > { %s2066_s23 = smov %s2059_s27 }
 0x4d8   :  { %950 = vsyncpa [#allocation8], 1 }
 0x4d9   :  { %952 = vsyncpa [#allocation8 + $0x1], 1 }
 0x4da   :  { %953 = vsyncpa [#allocation11], 1 }
 0x4db   :  { %954 = vsyncpa [#allocation9], 1 }
 0x4dc   :  { %956 = vsyncpa [#allocation9 + $0x1], 1 }
 0x4dd   :  { %957 = vsyncmov [#allocation6] }
 0x4e0   :  { %s958_s15 = vpop.sfrf %957 }
 0x4e1   :  { %p1143_p6 = scmp.ne.s32.totalorder %s958_s15, 0 }
 0x4e3   :  { %962 = shalt.err (%p1143_p6)  }

// kernel: tpu_custom_call.1
= control target key start
LH: loop header
LB: loop body
LE: loop exit
PB: predicated region body
PF: predicated region fallthrough
CT: control target
= control target key end

     0   :  { %s1992_s0 = inlined_call_operand.hbm [shape: f32[2,48,128], index: 0, kind: input, shape index: {}]   ;;  %s1993_s1 = inlined_call_operand.hbm [shape: f32[7,128], index: 1, kind: input, shape index: {}]   ;;  %s1994_s2 = inlined_call_operand.vmem [shape: f32[1,128], index: 2, kind: input, shape index: {}]   ;;  %s1995_s3 = inlined_call_operand.vmem [shape: f32[1,128], index: 3, kind: input, shape index: {}]   ;;  %s1996_s4 = inlined_call_operand.vmem [shape: f32[1,128], index: 4, kind: input, shape index: {}]   ;;  %s1997_s5 = inlined_call_operand.hbm [shape: bf16[128,128], index: 5, kind: input, shape index: {}]   ;;  %s1998_s6 = inlined_call_operand.vmem [shape: f32[1,128], index: 6, kind: input, shape index: {}]   ;;  %s1999_s7 = inlined_call_operand.vmem [shape: f32[1,128], index: 7, kind: input, shape index: {}]   ;;  %s2000_s8 = inlined_call_operand.vmem [shape: f32[1,128], index: 8, kind: input, shape index: {}]   ;;  %s2001_s9 = inlined_call_operand.hbm [shape: bf16[128,128], index: 9, kind: input, shape index: {}]   ;;  %s2002_s10 = inlined_call_operand.vmem [shape: f32[1,128], index: 10, kind: input, shape index: {}]   ;;  %s2003_s11 = inlined_call_operand.hbm [shape: f32[2,48,128], index: 11, kind: output, shape index: {}]  }
   0x1   :  { %2022 = sst [smem:[#allocation34_spill]] %s2000_s8 }
   0x2   :  { %2023 = sst [smem:[#allocation35_spill]] %s2002_s10 }
   0x3   :  { %2024 = sst [smem:[#allocation36_spill]] %s2003_s11 }
   0x4   :  { %16 = vsyncpa [#allocation8], 0 }
   0x5   :  { %17 = vsyncpa [#allocation11], 0 }
   0x6   :  { %18 = vsyncpa [#allocation9], 0 }
   0x7   :  { %20 = vsyncpa [#allocation9 + $0x1], 0  ;;  %s1665_s17 = smov 0   ;;  %s1667_s18 = smov 0  }
   0x8   :  { %s1669_s19 = smov 0   ;;  %s1671_s20 = smov 0  }
   0x9   :  { %s1673_s21 = smov 0   ;;  %s1675_s22 = smov 0  }
   0xa   :  { %s1677_s23 = smov 0   ;;  %s1679_s24 = smov 0  }
   0xb   :  { %s1681_s25 = smov 0   ;;  %s1683_s26 = smov 0  }
   0xc LB: > { %2025 = sst [smem:[#allocation22_spill]] %s1552_s17  ;;  %s1066_s27 = sadd.s32 4294967295, %s1588_s26   ;;  %s1588_s26 = sphi %s1683_s26, %s26_s26   ;;  %s1584_s25 = sphi %s1681_s25, %s2061_s25   ;;  %s1580_s24 = sphi %s1679_s24, %s2060_s24   ;;  %s1576_s23 = sphi %s1677_s23, %s2066_s23   ;;  %s1572_s22 = sphi %s1675_s22, %s2058_s22   ;;  %s1568_s21 = sphi %s1673_s21, %s2065_s21   ;;  %s1564_s20 = sphi %s1671_s20, %s2064_s20   ;;  %s1560_s19 = sphi %s1669_s19, %s2055_s19   ;;  %s1556_s18 = sphi %s1667_s18, %s2063_s18   ;;  %s1552_s17 = sphi %s1665_s17, %s2062_s17  }
   0xd   : > { %2026 = sst [smem:[#allocation23_spill]] %s1560_s19  ;;  %s1067_s28 = sadd.s32 4294967294, %s1588_s26  }
   0xe   : > { %2027 = sst [smem:[#allocation24_spill]] %s1576_s23  ;;  %s38_s29 = sadd.s32 1, %s1576_s23 }
   0xf   : > { %2028 = sst [smem:[#allocation25_spill]] %s1580_s24  ;;  %s41_s30 = sadd.s32 1, %s1580_s24 }
  0x10   : > { %2029 = sst [smem:[#allocation26_spill]] %s1584_s25  ;;  %p39_p0 = scmp.ge.s32.totalorder %s38_s29, 3 }
  0x11   : > { %2030 = sst [smem:[#allocation27_spill]] %s1588_s26  ;;  %s45_s12 = sadd.s32 1, %s1584_s25 }
  0x12   : > { %s259_s13 = smul.u32 %s1576_s23, %s1580_s24  ;;  %s266_s14 = sadd.s32 1, %s1560_s19 }
  0x13   : > { %s2068_s29 = smov (%p39_p0, %s38_s29), 0  ;;  %s2070_s30 = smov (!%p39_p0, %s41_s30), %s1580_s24 }
  0x14   : > { %2031 = sst [smem:[#allocation28_spill]] %s2068_s29  ;;  %p276_p1 = scmp.ne.s32.totalorder %s1560_s19, %s1556_s18 }
  0x15   : > { %p277_p2 = scmp.eq.s32.totalorder %s1066_s27, 11  ;;  %p43_p3 = scmp.ge.s32.totalorder %s2070_s30, 2 }
  0x16   : > { %p282_p4 = scmp.ne.s32.totalorder %s1556_s18, %s1552_s17  ;;  %p283_p6 = scmp.eq.s32.totalorder %s1067_s28, 11 }
  0x17   : > { %p1730_p5 = por %p277_p2, %p276_p1  ;;  %s2072_s30 = smov (%p43_p3, %s2070_s30), 0 }
  0x18   : > { %2034 = sst [smem:[#allocation30_spill]] %s2072_s30  ;;  %s2074_s12 = smov (!%p43_p3, %s45_s12), %s1584_s25 }
  0x19   : > { %s2032_s15 = scalar_select %p1730_p5, 1, 0 }
  0x1a   : > { %s260_s16 = smul.u32 %s2072_s30, %s2068_s29  ;;  %p1739_p7 = por %p283_p6, %p282_p4 }
  0x1b   : > { %2033 = sst [smem:[#allocation29_spill]] %s2032_s15  ;;  %p47_p8 = scmp.ge.s32.totalorder %s2074_s12, 2 }
  0x1c   : > { %s2035_s23 = scalar_select %p1739_p7, 1, 0 }
  0x1d   : > { %p1068_p9 = scmp.ge.s32.totalorder %s1588_s26, 1  ;;  %s262_s24 = ssub.s32 %s259_s13, %s260_s16 }
  0x1e   : > { %2036 = sst [smem:[#allocation31_spill]] %s2035_s23  ;;  %p290_p10 = scmp.lt.s32.totalorder %s1588_s26, 13 }
  0x1f   : > { %s2076_s12 = smov (%p47_p8, %s2074_s12), 0  ;;  %p1753_p12 = scmp.eq.s32.totalorder %s1066_s27, 0 }
  0x20   : > { %2037 = sst [smem:[#allocation32_spill]] %s2076_s12  ;;  %p1747_p11 = pnand %p1068_p9, %p290_p10 }
  0x21   : > { %s261_s28 = ssub.s32 %s1584_s25, %s2076_s12  ;;  %s1590_s16 = smov [#allocation10]  }
  0x22   : > { %s2038_s17 = scalar_select %p1747_p11, 1, 0 }
  0x23   : > { %s2039_s30 = scalar_select %p1753_p12, 1, 0 }
  0x24   : > { %s263_s29 = sor.u32 %s262_s24, %s261_s28  ;;  %p1218_p13 = pneg %p1747_p11 }
  0x25   : > { %p264_p0 = scmp.eq.s32.totalorder %s263_s29, 0  ;;  %s322_s23 = sshll.u32 %s1590_s16, 4  ;;  %s323_s23 = int_to_ptr.vmem [resolvable:$true] %s322_s23 }
  0x26   : > { %p1761_p1 = pnand %p1753_p12, %p1218_p13  ;;  %s1360_s25 = scalar_lea.hbm %s1997_s5, 1024 }
  0x27   : > { %s1766_s26 = scalar_select %p264_p0, %s1560_s19, %s266_s14  }
  0x28   : > { %p1361_p2 = scmp.ne.s32.totalorder %s1997_s5, %s1360_s25  ;;  %p1776_p3 = pneg %p1761_p1 }
  0x29   : > { %2041 = sst [smem:[#allocation33_spill]] %s1766_s26  ;;  %p1367_p8 = scmp.lt.u32.totalorder %s1360_s25, %s1997_s5 }
  0x2a   : > { %p1363_p4 = pnand %p1776_p3, %p1361_p2 }
  0x2c   : > { %p1364_p6 = pneg %p1363_p4 }
  0x2e   : > { %p1369_p9 = pnand %p1367_p8, %p1364_p6 }
  0x30   : > { %1372 = shalt.err (!%p1369_p9)
}
  0x31   : > { %s1373_s12 = scalar_lea.vmem %s323_s23, 1024  ;;  %p1381_p7 = scmp.lt.s32.totalorder %s323_s23, %s323_s23 }
  0x32   : > { %p1374_p10 = scmp.ne.s32.totalorder %s323_s23, %s1373_s12  ;;  %p1382_p5 = scmp.lt.s32.totalorder %s1373_s12, %s1373_s12 }
  0x34   : > { %p1376_p13 = pnand %p1374_p10, %p1776_p3  ;;  %p1383_p12 = por %p1382_p5, %p1381_p7 }
  0x36   : > { %p1377_p0 = pneg %p1376_p13 }
  0x38   : > { %p1384_p11 = pnand %p1383_p12, %p1377_p0 }
  0x3a   : > { %1387 = shalt.err (!%p1384_p11)
}
  0x3b   : > { %s1591_s11 = smov 64   ;;  %s1592_s16 = smov 4  }
  0x3c   : > { %1224 = dma.hbm_to_vmem [thread:$0]  (!%p1761_p1), %s1997_s5, 1024, %s323_s23, [#allocation11], %s1591_s11, %s1591_s11, %s1592_s16  }
  0x3d   : > { %s1593_s24 = smov [#allocation7]   ;;  %s1594_s28 = smov [#allocation12]  }
  0x3e   : > { %s303_s14 = sshll.u32 %s1593_s24, 4  ;;  %s344_s26 = sshll.u32 %s1594_s28, 4  ;;  %s304_s14 = int_to_ptr.vmem [resolvable:$true] %s303_s14  ;;  %s1795_s26 = int_to_ptr.vmem [resolvable:$true] %s344_s26 }
  0x3f   : > { %s1388_s15 = scalar_lea.hbm %s1993_s1, 128 }
  0x40   : > { %p1389_p5 = scmp.ne.s32.totalorder %s1993_s1, %s1388_s15  ;;  %p1395_p12 = scmp.lt.u32.totalorder %s1388_s15, %s1993_s1 }
  0x42   : > { %p1391_p7 = pnand %p1389_p5, %p1776_p3 }
  0x44   : > { %p1392_p11 = pneg %p1391_p7 }
  0x46   : > { %p1397_p2 = pnand %p1395_p12, %p1392_p11 }
  0x48   : > { %1400 = shalt.err (!%p1397_p2)
}
  0x49   : > { %s1401_s27 = scalar_lea.vmem %s304_s14, 128  ;;  %p1409_p9 = scmp.lt.s32.totalorder %s304_s14, %s304_s14 }
  0x4a   : > { %p1402_p4 = scmp.ne.s32.totalorder %s304_s14, %s1401_s27  ;;  %p1410_p10 = scmp.lt.s32.totalorder %s1401_s27, %s1401_s27 }
  0x4c   : > { %p1404_p6 = pnand %p1402_p4, %p1776_p3  ;;  %p1411_p13 = por %p1410_p10, %p1409_p9 }
  0x4e   : > { %p1405_p8 = pneg %p1404_p6 }
  0x50   : > { %p1412_p0 = pnand %p1411_p13, %p1405_p8 }
  0x52   : > { %1415 = shalt.err (!%p1412_p0)
}
  0x53   : > { %1221 = dma.hbm_to_vmem [thread:$0]  (!%p1761_p1), %s1993_s1, 128, %s304_s14, [#allocation8]  }
  0x54   : > { %s1416_s24 = scalar_lea.hbm %s2001_s9, 1024 }
  0x55   : > { %p1417_p5 = scmp.ne.s32.totalorder %s2001_s9, %s1416_s24  ;;  %p1423_p12 = scmp.lt.u32.totalorder %s1416_s24, %s2001_s9 }
  0x57   : > { %p1419_p7 = pnand %p1417_p5, %p1776_p3 }
  0x59   : > { %p1420_p11 = pneg %p1419_p7 }
  0x5b   : > { %p1425_p2 = pnand %p1423_p12, %p1420_p11 }
  0x5d   : > { %1428 = shalt.err (!%p1425_p2)
}
  0x5e   : > { %s1429_s14 = scalar_lea.vmem %s1795_s26, 1024  ;;  %p1437_p9 = scmp.lt.s32.totalorder %s1795_s26, %s1795_s26 }
  0x5f   : > { %p1430_p4 = scmp.ne.s32.totalorder %s1795_s26, %s1429_s14  ;;  %p1438_p10 = scmp.lt.s32.totalorder %s1429_s14, %s1429_s14 }
  0x61   : > { %p1432_p6 = pnand %p1430_p4, %p1776_p3  ;;  %p1439_p13 = por %p1438_p10, %p1437_p9 }
  0x63   : > { %p1433_p8 = pneg %p1432_p6 }
  0x65   : > { %p1440_p0 = pnand %p1439_p13, %p1433_p8 }
  0x67   : > { %1443 = shalt.err (!%p1440_p0)
}
  0x68   : > { %1227 = dma.hbm_to_vmem [thread:$0]  (!%p1761_p1), %s2001_s9, 1024, %s1795_s26, [#allocation11], %s1591_s11, %s1591_s11, %s1592_s16  }
  0x69   : > { %p2043_p5 = scmp.ne.s32.totalorder %s2038_s17, 0 }
  0x6a   : > { %p2044_p3 = scmp.ne.s32.totalorder (!%p2043_p5), %s2039_s30, 0 }
  0x6b   : > { %363 = sbr.rel (%p2043_p5) target bundleno = 1216 (0x4c0), region = 60 }
  0x72   : > { %1537 = dma.done.wait (%p2044_p3), [#allocation8], 128  }
  0x73   : > { %1539 = vsyncadd (%p2044_p3), [#allocation8], 4294967168 }
  0x74   : > { %1541 = dma.done.wait (%p2044_p3), [#allocation11], 2048  }
  0x75   : > { %1543 = vsyncadd (%p2044_p3), [#allocation11], 4294965248  ;;  %s401_s17 = sand.u32 1, %s1556_s18   ;;  %s1853_s26 = sshll.u32 %s1564_s20, 4 }
  0x76   : > { %s1076_s13 = sshll.u32 %s401_s17, 4  ;;  %p408_p1 = scmp.eq.s32.totalorder %s1568_s21, 0 }
  0x77   : > { %p409_p7 = scmp.eq.s32.totalorder %s1564_s20, 0  ;;  %s1861_s29 = scalar_lea.vmem [#allocation13], %s1076_s13 }
  0x79   : > { %p410_p11 = pnand %p409_p7, %p408_p1 }
  0x7a   : > { %s1144_s30 = smul.u32 (!%p410_p11), 768, %s1572_s22  ;;  %s1595_s11 = smov (!%p410_p11), [#allocation2 + $0x8]   ;;  %v1596_v0 = vmov (!%p410_p11), 0.0  }
  0x7b   : > { %413 = sbr.rel (%p410_p11) target bundleno = 149 (0x95), region = 76  ;;  %s425_s16 = sshll.u32 (!%p410_p11), %s1595_s11, 4  ;;  %429 = vst [vmem:[#allocation4] sm:$0x1] (!%p410_p11), %v1596_v0  ;;  %s426_s16 = int_to_ptr.vmem [resolvable:$true] %s425_s16 }
  0x7c   : > { %s416_s15 = scalar_lea.hbm (!%p410_p11), %s1992_s0, %s1144_s30  ;;  %s1446_s25 = scalar_lea.hbm (!%p410_p11), %s1992_s0, 1536 }
  0x7d   : > { %s1444_s24 = scalar_lea.hbm (!%p410_p11), %s416_s15, 768  ;;  %p1447_p2 = scmp.lt.u32.totalorder (!%p410_p11), %s416_s15, %s1992_s0 }
  0x7e   : > { %p1445_p12 = scmp.ne.s32.totalorder (!%p410_p11), %s416_s15, %s1444_s24  ;;  %p1448_p4 = scmp.lt.u32.totalorder (!%p410_p11), %s1446_s25, %s1444_s24 }
  0x7f   : > { %p1450_p8 = scmp.lt.u32.totalorder (!%p410_p11), %s1444_s24, %s416_s15 }
  0x80   : > { %p1449_p6 = por (!%p410_p11), %p1448_p4, %p1447_p2 }
  0x82   : > { %p1451_p9 = por %p1450_p8, %p1449_p6 }
  0x84   : > { %p1452_p10 = pnand %p1451_p9, %p1445_p12 }
  0x86   : > { %1455 = shalt.err (!%p1452_p10)  }
  0x87   : > { %s1456_s27 = scalar_lea.vmem %s426_s16, 768  ;;  %s1597_s8 = smov [#allocation2]  }
  0x88   : > { %p1457_p13 = scmp.ne.s32.totalorder %s426_s16, %s1456_s27  ;;  %s1458_s13 = sshll.u32 %s1597_s8, 4  ;;  %s1459_s13 = int_to_ptr.vmem [resolvable:$false] %s1458_s13 }
  0x89   : > { %s1460_s30 = scalar_lea.vmem %s1459_s13, 1024  ;;  %p1461_p0 = scmp.lt.s32.totalorder %s426_s16, %s1459_s13 }
  0x8a   : > { %p1462_p5 = scmp.lt.s32.totalorder %s1460_s30, %s1456_s27 }
  0x8c   : > { %p1463_p3 = por %p1462_p5, %p1461_p0 }
  0x8e   : > { %p1464_p1 = pnand %p1463_p3, %p1457_p13 }
  0x90   : > { %1467 = shalt.err (!%p1464_p1)  }
  0x91   : > { %428 = dma.hbm_to_vmem [thread:$0]  %s416_s15, 768, %s426_s16, [#allocation6] }
  0x92   : > { %1544 = dma.done.wait [#allocation6], 768 }
  0x93   : > { %1545 = vsyncadd [#allocation6], 4294966528  ;;  %433 = vst [vmem:[#allocation2] sm:$0xff] %v1596_v0 }
  0x94   : > { %434 = vst [vmem:[#allocation2 + $0x38] sm:$0xff] %v1596_v0 }
  0x95 PF: > { %p1079_p11 = scmp.ne.s32.totalorder %s1568_s21, 0 }
  0x96   : > { %v1083_v1 = vld [vmem:[#allocation7] ss:$0 sm:$0xff] (!%p1079_p11)  ;;  %v1087_v2 = vld [vmem:[#allocation7 + $0x1] ss:$0 sm:$0xff] (!%p1079_p11)  ;;  %s1875_s11 = scalar_lea.vmem (!%p1079_p11), [#allocation2], %s1853_s26  ;;  %v1332_v51 = vld [vmem:[#allocation10] sm:$0xff] (!%p1079_p11)   ;;  %v544_v53 = vlaneseq (!%p1079_p11) }
  0x97   : > { %437 = sbr.rel (%p1079_p11) target bundleno = 751 (0x2ef), region = 84  ;;  %v1091_v8 = vld [vmem:[#allocation7 + $0x2] ss:$0 sm:$0xff] (!%p1079_p11)  ;;  %v1095_v10 = vld [vmem:[#allocation7 + $0x3] ss:$0 sm:$0xff] (!%p1079_p11)  ;;  %v1598_v52 = vmov (!%p1079_p11), 0.0  }
  0x98   : > { %v1099_v13 = vld [vmem:[#allocation7 + $0x4] ss:$0 sm:$0xff] (!%p1079_p11)  ;;  %v1103_v17 = vld [vmem:[#allocation7 + $0x5] ss:$0 sm:$0xff] (!%p1079_p11)  ;;  %v1107_v23 = vld [vmem:[#allocation7 + $0x6] ss:$0 sm:$0xff] (!%p1079_p11)  ;;  %1163 = vmatprep.subr.bf16.mxu0 (!%p1079_p11), %v1598_v52 }
  0x99   : > { %v1108_v43 = vld [vmem:[%s1994_s2] ss:$0 sm:$0xff] (!%p1079_p11)  ;;  %1164 = vmatpush3.bf16.msra.mxu0 (!%p1079_p11), %v1332_v51  ;;  %v545_v54 = vand.u32 (!%p1079_p11), 127, %v544_v53  ;;  %vm1599_vm1 = vmmov (!%p1079_p11), 0   ;;  %s713_s23 = sshra.s32 (!%p1079_p11), %s1853_s26, 4 }
  0x9a   : > { %1165 = vmatprep.subr.bf16.mxu0 (!%p1079_p11), %v1598_v52  ;;  %1179 = vmatprep.mubr.msk.bf16.mxu0 (!%p1079_p11), %vm1599_vm1, %v1598_v52  ;;  %s1120_s14 = sshll.u32 (!%p1079_p11), %s713_s23, 3 }
  0x9b   : > { %v1081_v3 = vld [vmem:[%s1875_s11 + $0x5] sm:$0xff] (!%p1079_p11)  ;;  %v1082_v19 = vld [vmem:[%s1875_s11 + $0xd] sm:$0xff] (!%p1079_p11)  ;;  %vm546_vm0 = vcmp.lt.s32.totalorder (!%p1079_p11), %v545_v54, 32  ;;  %s716_s27 = scalar_lea.vmem (!%p1079_p11), [#allocation3], %s1120_s14 }
  0x9c   : > { %v1085_v4 = vld [vmem:[%s1875_s11 + $0x6] sm:$0xff] (!%p1079_p11)  ;;  %v447_v6 = vmul.f32 (!%p1079_p11), %v1083_v1, %v1081_v3  ;;  %v1086_v20 = vld [vmem:[%s1875_s11 + $0xe] sm:$0xff] (!%p1079_p11)  ;;  %v448_v24 = vmul.f32 (!%p1079_p11), %v1083_v1, %v1082_v19  ;;  %v1335_v3 = vld [vmem:[#allocation10 + $0x18] sm:$0xff] (!%p1079_p11)  }
  0x9d   : > { %v1089_v5 = vld [vmem:[%s1875_s11 + $0x7] sm:$0xff] (!%p1079_p11)  ;;  %v458_v7 = vmul.f32 (!%p1079_p11), %v1087_v2, %v1085_v4  ;;  %v459_v25 = vmul.f32 (!%p1079_p11), %v1087_v2, %v1086_v20  ;;  %v1090_v26 = vld [vmem:[%s1875_s11 + $0xf] sm:$0xff] (!%p1079_p11)  ;;  %v1110_v20 = vld [vmem:[%s1996_s4] ss:$0 sm:$0xff] (!%p1079_p11) }
  0x9e   : > { %v1093_v9 = vld [vmem:[%s1875_s11 + $0x8] sm:$0xff]  ;;  %v471_v11 = vmul.f32 %v1091_v8, %v1089_v5  ;;  %v1094_v27 = vld [vmem:[%s1875_s11 + $0x10] sm:$0xff]  ;;  %v472_v28 = vmul.f32 %v1091_v8, %v1090_v26 }
  0x9f   : > { %v1097_v12 = vld [vmem:[%s1875_s11 + $0x9] sm:$0xff]  ;;  %v460_v14 = vadd.f32 %v458_v7, %v447_v6  ;;  %v484_v15 = vmul.f32 %v1095_v10, %v1093_v9  ;;  %v1098_v29 = vld [vmem:[%s1875_s11 + $0x11] sm:$0xff]  ;;  %v461_v33 = vadd.f32 %v459_v25, %v448_v24  ;;  %v485_v34 = vmul.f32 %v1095_v10, %v1094_v27  ;;  %v1339_v7 = vld [vmem:[#allocation10 + $0x38] sm:$0xff]  }
  0xa0   : > { %v1101_v16 = vld [vmem:[%s1875_s11 + $0xa] sm:$0xff]  ;;  %v497_v22 = vmul.f32 %v1099_v13, %v1097_v12  ;;  %v1102_v30 = vld [vmem:[%s1875_s11 + $0x12] sm:$0xff]  ;;  %v498_v39 = vmul.f32 %v1099_v13, %v1098_v29  ;;  %v1336_v4 = vld [vmem:[#allocation10 + $0x20] sm:$0xff]  }
  0xa1   : > { %v1105_v18 = vld [vmem:[%s1875_s11 + $0xb] sm:$0xff]  ;;  %v473_v21 = vadd.f32 %v471_v11, %v460_v14  ;;  %v510_v32 = vmul.f32 %v1103_v17, %v1101_v16  ;;  %v1106_v35 = vld [vmem:[%s1875_s11 + $0x13] sm:$0xff]  ;;  %v474_v38 = vadd.f32 %v472_v28, %v461_v33  ;;  %v511_v42 = vmul.f32 %v1103_v17, %v1102_v30  ;;  %v1109_v16 = vld [vmem:[%s1995_s3] ss:$0 sm:$0xff] }
  0xa2   : > { %v523_v37 = vmul.f32 %v1107_v23, %v1105_v18  ;;  %v524_v46 = vmul.f32 %v1107_v23, %v1106_v35  ;;  %v1333_v1 = vld [vmem:[#allocation10 + $0x8] sm:$0xff]   ;;  %v1334_v2 = vld [vmem:[#allocation10 + $0x10] sm:$0xff]   ;;  %v1111_v25 = vld [vmem:[%s1998_s6] ss:$0 sm:$0xff] }
  0xa3   : > { %v486_v31 = vadd.f32 %v484_v15, %v473_v21  ;;  %v487_v41 = vadd.f32 %v485_v34, %v474_v38  ;;  %1166 = vmatpush3.bf16.msra.mxu0 %v1333_v1  ;;  %v1337_v5 = vld [vmem:[#allocation10 + $0x28] sm:$0xff]   ;;  %v1338_v6 = vld [vmem:[#allocation10 + $0x30] sm:$0xff]  }
  0xa4   : > { %1167 = vmatprep.subr.bf16.mxu0 %v1598_v52 }
  0xa5   : > { %v499_v36 = vadd.f32 %v497_v22, %v486_v31  ;;  %v500_v45 = vadd.f32 %v498_v39, %v487_v41 }
  0xa7   : > { %v512_v40 = vadd.f32 %v510_v32, %v499_v36  ;;  %v513_v48 = vadd.f32 %v511_v42, %v500_v45  ;;  %1168 = vmatpush3.bf16.msra.mxu0 %v1334_v2 }
  0xa8   : > { %1169 = vmatprep.subr.bf16.mxu0 %v1598_v52 }
  0xa9   : > { %v525_v44 = vadd.f32 %v523_v37, %v512_v40  ;;  %v526_v49 = vadd.f32 %v524_v46, %v513_v48 }
  0xab   : > { %v534_v47 = vadd.f32 %v1108_v43, %v525_v44  ;;  %v535_v50 = vadd.f32 %v1108_v43, %v526_v49  ;;  %1170 = vmatpush3.bf16.msra.mxu0 %v1335_v3 }
  0xac   : > { %1171 = vmatprep.subr.bf16.mxu0 %v1598_v52 }
  0xad   : > { %536 = vadd.xlane.f32.xlu0 %v534_v47 }
  0xaf   : > { %1172 = vmatpush3.bf16.msra.mxu0 %v1336_v4 }
  0xb0   : > { %1173 = vmatprep.subr.bf16.mxu0 %v1598_v52 }
  0xb1   : > { %538 = vadd.xlane.f32.xlu0 %v535_v50 }
  0xb3   : > { %1174 = vmatpush3.bf16.msra.mxu0 %v1337_v5 }
  0xb4   : > { %1175 = vmatprep.subr.bf16.mxu0 %v1598_v52 }
  0xb7   : > { %1176 = vmatpush3.bf16.msra.mxu0 %v1338_v6 }
  0xb8   : > { %1177 = vmatprep.subr.bf16.mxu0 %v1598_v52 }
  0xbb   : > { %1178 = vmatpush3.bf16.msra.mxu0 %v1339_v7 }
 0x13a   : > { %v537_v55 = vpop.xlane.xlu0 %536 }
 0x13b   : > { %v540_v56 = vmul.f32 0.03125, %v537_v55 }
 0x13d   : > { %v542_v57 = vsub.f32 %v534_v47, %v540_v56 }
 0x13e   : > { %v539_v58 = vpop.xlane.xlu0 %538 }
 0x13f   : > { %v541_v59 = vmul.f32 0.03125, %v539_v58  ;;  %v547_v60 = vsel %vm546_vm0, %v542_v57, 0.0 }
 0x140   : > { %v549_v61 = vmul.f32 %v547_v60, %v547_v60 }
 0x141   : > { %v543_v62 = vsub.f32 %v535_v50, %v541_v59  ;;  %v718_v59 = vld [vmem:[#allocation4] sm:$0x1] }
 0x142   : > { %551 = vadd.xlane.f32.xlu1 %v549_v61 }
 0x143   : > { %v548_v63 = vsel %vm546_vm0, %v543_v62, 0.0 }
 0x144   : > { %v550_v0 = vmul.f32 %v548_v63, %v548_v63 }
 0x146   : > { %553 = vadd.xlane.f32.xlu1 %v550_v0 }
 0x1cf   : > { %v552_v8 = vpop.xlane.xlu1 %551 }
 0x1d0   : > { %v555_v9 = vmul.f32 0.03125, %v552_v8 }
 0x1d2   : > { %v557_v10 = vadd.f32 1e-06, %v555_v9 }
 0x1d3   : > { %v554_v11 = vpop.xlane.xlu1 %553 }
 0x1d4   : > { %1340 = vrsqrt.f32 %v557_v10  ;;  %v556_v12 = vmul.f32 0.03125, %v554_v11 }
 0x1d6   : > { %v558_v13 = vadd.f32 1e-06, %v556_v12 }
 0x1d8   : > { %1342 = vrsqrt.f32 %v558_v13 }
 0x1de   : > { %v1341_v14 = vpop.eup %1340 }
 0x1df   : > { %v561_v15 = vmul.f32 %v1341_v14, %v542_v57 }
 0x1e1   : > { %v570_v19 = vmul.f32 %v1109_v16, %v561_v15 }
 0x1e2   : > { %v1343_v17 = vpop.eup %1342 }
 0x1e3   : > { %v562_v18 = vmul.f32 %v1343_v17, %v543_v62  ;;  %v579_v22 = vadd.f32 %v1110_v20, %v570_v19 }
 0x1e5   : > { %v571_v21 = vmul.f32 %v1109_v16, %v562_v18 }
 0x1e7   : > { %v580_v23 = vadd.f32 %v1110_v20, %v571_v21 }
 0x1e9   : > { %v581_v24 = vpack.c.bf16 %v580_v23, %v579_v22 }
 0x1eb   : > { %1180 = vmatmul.mubr.bf16.vlgmr.msra.gmra.mrb[0].mxu0 %v581_v24 }
 0x2be   : > { %v687_v26 = vpop.f32.mrb[0].mxu0 }
 0x2bf   : > { %v688_v27 = vadd.f32 %v1111_v25, %v687_v26  ;;  %v1181_v28 = vpop.f32.mrb[1].mxu0 }
 0x2c0   : > { %v690_v29 = vpop.f32.mrb[2].mxu0 }
 0x2c1   : > { %v696_v30 = vmul.f32 %v688_v27, %v688_v27  ;;  %v691_v31 = vadd.f32 %v1111_v25, %v690_v29  ;;  %v1182_v32 = vpop.f32.mrb[3].mxu0  ;;  %v694_v43 = vmul.f32 0.5, %v688_v27 }
 0x2c3   : > { %v698_v33 = vmul.f32 %v696_v30, %v688_v27  ;;  %v697_v34 = vmul.f32 %v691_v31, %v691_v31  ;;  %v695_v47 = vmul.f32 0.5, %v691_v31 }
 0x2c5   : > { %v700_v35 = vmul.f32 0.044715, %v698_v33  ;;  %v699_v36 = vmul.f32 %v697_v34, %v691_v31 }
 0x2c7   : > { %v702_v37 = vadd.f32 %v700_v35, %v688_v27  ;;  %v701_v38 = vmul.f32 0.044715, %v699_v36 }
 0x2c9   : > { %v704_v39 = vmul.f32 0.7978846, %v702_v37  ;;  %v703_v40 = vadd.f32 %v701_v38, %v691_v31 }
 0x2cb   : > { %1344 = vtanh.f32 %v704_v39  ;;  %v705_v41 = vmul.f32 0.7978846, %v703_v40 }
 0x2cd   : > { %1346 = vtanh.f32 %v705_v41 }
 0x2d5   : > { %v1345_v42 = vpop.eup %1344 }
 0x2d6   : > { %v708_v44 = vadd.f32 1.0, %v1345_v42 }
 0x2d7   : > { %v1347_v45 = vpop.eup %1346 }
 0x2d8   : > { %v710_v46 = vmul.f32 %v708_v44, %v694_v43  ;;  %v709_v48 = vadd.f32 1.0, %v1347_v45 }
 0x2da   : > { %v711_v49 = vmul.f32 %v709_v48, %v695_v47  ;;  %v719_v50 = vmul.f32 %v710_v46, %v710_v46 }
 0x2dc   : > { %v712_v51 = vpack.c.bf16 %v711_v49, %v710_v46  ;;  %v720_v52 = vmul.f32 %v711_v49, %v711_v49 }
 0x2de   : > { %717 = vst [vmem:[%s716_s27] sm:$0xff] %v712_v51  ;;  %v721_v53 = vadd.f32 %v720_v52, %v719_v50 }
 0x2e0   : > { %v722_v54 = vrot.slane %v721_v53, 4 }
 0x2e2   : > { %v723_v55 = vadd.f32 %v722_v54, %v721_v53 }
 0x2e4   : > { %v724_v56 = vrot.slane %v723_v55, 2 }
 0x2e6   : > { %v725_v57 = vadd.f32 %v724_v56, %v723_v55 }
 0x2e8   : > { %v726_v58 = vrot.slane %v725_v57, 1 }
 0x2ea   : > { %v727_v60 = vadd.f32 %v726_v58, %v725_v57 }
 0x2ec   : > { %v728_v61 = vadd.f32 %v727_v60, %v718_v59 }
 0x2ee   : > { %729 = vst [vmem:[#allocation4] sm:$0x1] %v728_v61 }
 0x2ef PF: > { %p730_p12 = scmp.eq.s32.totalorder %s1568_s21, 1 }
 0x2f1   : > { %p731_p2 = pnand %p730_p12, %p409_p7 }
 0x2f2   : > { %vm743_vm4 = vcmask (!%p731_p2), 1040384  }
 0x2f3   : > { %734 = sbr.rel (%p731_p2) target bundleno = 934 (0x3a6), region = 88 }
 0x2f5   : > { %v735_v62 = vld [vmem:[#allocation4] sm:$0x1] (!%p731_p2) }
 0x2f6   : > { %1348 = vrsqrt.f32 (!%p731_p2), %v735_v62  ;;  %vm738_vm2 = vcmp.eq.f32.partialorder (!%p731_p2), %v735_v62, inf  ;;  %v741_v0 = vand.u32 (!%p731_p2), 2147483648, %v735_v62  ;;  %vm740_vm3 = vcmp.eq.f32.partialorder (!%p731_p2), %v735_v62, 0.0 }
 0x300   : > { %v1349_v63 = vpop.eup %1348 }
 0x301   : > { %v737_v1 = vmul.f32 %v1349_v63, %v735_v62 }
 0x303   : > { %v739_v2 = vsel %vm738_vm2, %v735_v62, %v737_v1 }
 0x304   : > { %v742_v3 = vsel %vm740_vm3, %v741_v0, %v739_v2 }
 0x305   : > { %v744_v4 = vsel %vm743_vm4, %v742_v3, 0.0 }
 0x306   : > { %745 = vadd.xlane.f32.xlu0 %v744_v4 }
 0x393   : > { %v746_v5 = vpop.xlane.xlu0 %745 }
 0x394   : > { %v747_v6 = vmul.f32 0.015625, %v746_v5 }
 0x396   : > { %v748_v7 = vadd.f32 1e-06, %v747_v6 }
 0x398   : > { %1350 = vrcp.f32 %v748_v7 }
 0x3a2   : > { %v1351_v8 = vpop.eup %1350 }
 0x3a3   : > { %v750_v9 = vmul.f32 %v1351_v8, %v742_v3 }
 0x3a5   : > { %751 = vst [vmem:[#allocation5] sm:$0x1] %v750_v9 }
 0x3a6 PF: > { %p1121_p7 = scmp.ne.s32.totalorder %s1568_s21, 1 }
 0x3a7   : > { %v1352_v10 = vld [vmem:[#allocation12] sm:$0xff] (!%p1121_p7)   ;;  %v1600_v11 = vmov (!%p1121_p7), 0.0   ;;  %v1353_v12 = vld [vmem:[#allocation12 + $0x8] sm:$0xff] (!%p1121_p7)   ;;  %vm1601_vm5 = vmmov (!%p1121_p7), 0   ;;  %s755_s8 = sshra.s32 (!%p1121_p7), %s1853_s26, 4  ;;  %v1354_v13 = vld [vmem:[#allocation12 + $0x10] sm:$0xff] (!%p1121_p7)  }
 0x3a8   : > { %754 = sbr.rel (%p1121_p7) target bundleno = 1187 (0x4a3), region = 92  ;;  %1183 = vmatprep.subr.bf16.mxu0 (!%p1121_p7), %v1600_v11  ;;  %1199 = vmatprep.mubr.msk.bf16.mxu0 (!%p1121_p7), %vm1601_vm5, %v1600_v11  ;;  %s1122_s13 = sshll.u32 (!%p1121_p7), %s755_s8, 3  ;;  %v1355_v17 = vld [vmem:[#allocation12 + $0x18] sm:$0xff] (!%p1121_p7)   ;;  %v1356_v21 = vld [vmem:[#allocation12 + $0x20] sm:$0xff] (!%p1121_p7)   ;;  %v1357_v25 = vld [vmem:[#allocation12 + $0x28] sm:$0xff] (!%p1121_p7)  }
 0x3a9   : > { %1184 = vmatpush3.bf16.msra.mxu0 (!%p1121_p7), %v1352_v10  ;;  %s758_s30 = scalar_lea.vmem (!%p1121_p7), [#allocation3], %s1122_s13  ;;  %v1124_v22 = vld [vmem:[%s1999_s7] ss:$0 sm:$0xff] (!%p1121_p7)  ;;  %s2045_s15 = sld [smem:[#allocation34_spill]] (!%p1121_p7)  ;;  %v1358_v29 = vld [vmem:[#allocation12 + $0x30] sm:$0xff] (!%p1121_p7)  }
 0x3aa   : > { %1185 = vmatprep.subr.bf16.mxu0 (!%p1121_p7), %v1600_v11  ;;  %v759_v14 = vld [vmem:[%s758_s30] sm:$0xff] (!%p1121_p7)  ;;  %s2046_s12 = sld [smem:[#allocation35_spill]] (!%p1121_p7)  ;;  %s994_s25 = scalar_lea.vmem (!%p1121_p7), [#allocation2], %s1853_s26 }
 0x3ab   : > { %v760_v15 = vunpack.c.l.bf16 (!%p1121_p7), %v759_v14  ;;  %v761_v16 = vunpack.c.h.bf16 (!%p1121_p7), %v759_v14  ;;  %v1359_v32 = vld [vmem:[#allocation12 + $0x38] sm:$0xff] (!%p1121_p7)   ;;  %v1136_v36 = vld [vmem:[%s994_s25 + $0x8] sm:$0xff] (!%p1121_p7)  ;;  %v1137_v40 = vld [vmem:[%s994_s25 + $0x10] sm:$0xff] (!%p1121_p7) }
 0x3ac   : > { %v1123_v18 = vld [vmem:[#allocation5] ss:$0 sm:$0xff] (!%p1121_p7) }
 0x3ad   : > { %1186 = vmatpush3.bf16.msra.mxu0 (!%p1121_p7), %v1353_v12  ;;  %v770_v19 = vmul.f32 (!%p1121_p7), %v1123_v18, %v760_v15  ;;  %v771_v20 = vmul.f32 (!%p1121_p7), %v1123_v18, %v761_v16 }
 0x3ae   : > { %1187 = vmatprep.subr.bf16.mxu0 (!%p1121_p7), %v1600_v11 }
 0x3af   : > { %v778_v23 = vmul.f32 %v1124_v22, %v770_v19  ;;  %v779_v24 = vmul.f32 %v1124_v22, %v771_v20  ;;  %v1125_v26 = vld [vmem:[%s2045_s15] ss:$0 sm:$0xff] }
 0x3b0   : > { %v1126_v34 = vld [vmem:[%s2046_s12] ss:$0 sm:$0xff] }
 0x3b1   : > { %1188 = vmatpush3.bf16.msra.mxu0 %v1354_v13  ;;  %v787_v27 = vadd.f32 %v1125_v26, %v778_v23  ;;  %v788_v28 = vadd.f32 %v1125_v26, %v779_v24 }
 0x3b2   : > { %1189 = vmatprep.subr.bf16.mxu0 %v1600_v11 }
 0x3b3   : > { %v789_v30 = vadd.f32 %v787_v27, %v760_v15  ;;  %v790_v31 = vadd.f32 %v788_v28, %v761_v16 }
 0x3b5   : > { %1190 = vmatpush3.bf16.msra.mxu0 %v1355_v17  ;;  %v791_v33 = vpack.c.bf16 %v790_v31, %v789_v30 }
 0x3b6   : > { %1191 = vmatprep.subr.bf16.mxu0 %v1600_v11 }
 0x3b9   : > { %1192 = vmatpush3.bf16.msra.mxu0 %v1356_v21 }
 0x3ba   : > { %1193 = vmatprep.subr.bf16.mxu0 %v1600_v11 }
 0x3bd   : > { %1194 = vmatpush3.bf16.msra.mxu0 %v1357_v25 }
 0x3be   : > { %1195 = vmatprep.subr.bf16.mxu0 %v1600_v11 }
 0x3c1   : > { %1196 = vmatpush3.bf16.msra.mxu0 %v1358_v29 }
 0x3c2   : > { %1197 = vmatprep.subr.bf16.mxu0 %v1600_v11 }
 0x3c5   : > { %1198 = vmatpush3.bf16.msra.mxu0 %v1359_v32 }
 0x3c8   : > { %1200 = vmatmul.mubr.bf16.vlgmr.msra.gmra.mrb[0].mxu0 %v791_v33 }
 0x49b   : > { %v897_v35 = vpop.f32.mrb[0].mxu0 }
 0x49c   : > { %v898_v37 = vadd.f32 %v1126_v34, %v897_v35  ;;  %v1201_v38 = vpop.f32.mrb[1].mxu0 }
 0x49d   : > { %v900_v39 = vpop.f32.mrb[2].mxu0 }
 0x49e   : > { %v908_v41 = vadd.f32 %v1136_v36, %v898_v37  ;;  %v901_v42 = vadd.f32 %v1126_v34, %v900_v39  ;;  %v1202_v43 = vpop.f32.mrb[3].mxu0 }
 0x4a0   : > { %910 = vst [vmem:[%s1861_s29] sm:$0xff] %v908_v41  ;;  %v909_v44 = vadd.f32 %v1137_v40, %v901_v42 }
 0x4a2   : > { %911 = vst [vmem:[%s1861_s29 + $0x8] sm:$0xff] %v909_v44 }
 0x4a3 PF: > { %s2047_s23 = sld [smem:[#allocation29_spill]]  ;;  %s920_s14 = smul.u32 %s1564_s20, %s1568_s21 }
 0x4a4   : > { %s1203_s26 = smul.u32 6, %s1572_s22  ;;  %s929_s27 = sshll.u32 %s1861_s29, 4  ;;  %s1925_s27 = int_to_ptr.vmem [resolvable:$true] %s929_s27 }
 0x4a5   : > { %s1139_s8 = sshll.u32 %s920_s14, 1  ;;  %s2048_s10 = sld [smem:[#allocation36_spill]] }
 0x4a6   : > { %s926_s13 = sadd.s32 %s1203_s26, %s1139_s8  ;;  %s1934_s15 = scalar_lea.sflag [#allocation9], %s401_s17 }
 0x4a7   : > { %s1140_s30 = sshll.u32 %s926_s13, 7  ;;  %s1468_s24 = scalar_lea.vmem %s1925_s27, 256 }
 0x4a8   : > { %p1469_p4 = scmp.ne.s32.totalorder %s1925_s27, %s1468_s24  ;;  %s1602_s20 = smov [#allocation13]  }
 0x4a9   : > { %p2049_p6 = scmp.ne.s32.totalorder %s2047_s23, 0  ;;  %s1472_s21 = sshll.u32 %s1602_s20, 4  ;;  %s1473_s21 = int_to_ptr.vmem [resolvable:$false] %s1472_s21 }
 0x4aa   : > { %s1474_s22 = scalar_lea.vmem %s1473_s21, 512  ;;  %p1475_p10 = scmp.lt.s32.totalorder %s1925_s27, %s1473_s21 }
 0x4ab   : > { %s1930_s19 = scalar_lea.hbm %s2048_s10, %s1140_s30  ;;  %p1470_p8 = pnand %p1469_p4, %p2049_p6 }
 0x4ac   : > { %p1476_p13 = scmp.lt.s32.totalorder %s1474_s22, %s1468_s24 }
 0x4ad   : > { %p1471_p9 = pneg %p1470_p8 }
 0x4ae   : > { %p1477_p0 = por %p1476_p13, %p1475_p10 }
 0x4b0   : > { %p1478_p5 = pnand %p1477_p0, %p1471_p9 }
 0x4b2   : > { %1481 = shalt.err (!%p1478_p5)
}
 0x4b3   : > { %s1482_s17 = scalar_lea.hbm %s1930_s19, 256  ;;  %s1486_s12 = scalar_lea.hbm %s2048_s10, 1536 }
 0x4b4   : > { %p1483_p3 = scmp.ne.s32.totalorder %s1930_s19, %s1482_s17  ;;  %p1487_p12 = scmp.lt.u32.totalorder %s1930_s19, %s2048_s10 }
 0x4b5   : > { %p1488_p2 = scmp.lt.u32.totalorder %s1486_s12, %s1482_s17  ;;  %p1490_p4 = scmp.lt.u32.totalorder %s1482_s17, %s1930_s19 }
 0x4b6   : > { %p1484_p1 = pnand %p1483_p3, %p2049_p6 }
 0x4b7   : > { %p1489_p7 = por %p1488_p2, %p1487_p12 }
 0x4b8   : > { %p1485_p11 = pneg %p1484_p1 }
 0x4b9   : > { %p1491_p8 = por %p1490_p4, %p1489_p7 }
 0x4bb   : > { %p1492_p9 = pnand %p1491_p8, %p1485_p11 }
 0x4bd   : > { %1495 = shalt.err (!%p1492_p9)
}
 0x4be   : > { %s1603_s26 = smov 128   ;;  %s1604_s8 = smov 8  }
 0x4bf   : > { %1216 = dma.vmem_to_hbm [thread:$0]  (%p2049_p6), %s1925_s27, 256, %s1930_s19, %s1934_s15, %s1603_s26, %s1603_s26, %s1604_s8  }
 0x4c0 PF: > { %s2050_s13 = sld [smem:[#allocation27_spill]]  ;;  %s2051_s30 = sld [smem:[#allocation22_spill]] }
 0x4c1   : > { %s2052_s11 = sld [smem:[#allocation31_spill]] }
 0x4c6   : > { %p1238_p10 = scmp.ge.s32.totalorder %s2050_s13, 2  ;;  %s944_s16 = sand.u32 1, %s2051_s30  }
 0x4c7   : > { %p2053_p13 = scmp.ne.s32.totalorder %s2052_s11, 0  ;;  %s945_s24 = scalar_lea.sflag [#allocation9], %s944_s16 }
 0x4c9   : > { %p1229_p0 = pnand %p1238_p10, %p2053_p13 }
 0x4cb   : > { %1547 = dma.done.wait (!%p1229_p0), %s945_s24, 256  }
 0x4cc   : > { %1549 = vsyncadd (!%p1229_p0), %s945_s24, 4294967040  ;;  %s26_s26 = sadd.s32 1, %s2050_s13   ;;  %s2054_s20 = sld [smem:[#allocation23_spill]] }
 0x4cd   : > { %p23_p5 = scmp.ge.s32.totalorder %s26_s26, 14   ;;  %s2055_s19 = sld [smem:[#allocation33_spill]] }
 0x4ce   : > { %s2056_s21 = sld [smem:[#allocation24_spill]]  ;;  %s2057_s23 = sld [smem:[#allocation25_spill]] }
 0x4cf   : > { %s2058_s22 = sld [smem:[#allocation26_spill]]  ;;  %s2059_s27 = sld [smem:[#allocation28_spill]] }
 0x4d0   : > { %s2060_s24 = sld [smem:[#allocation30_spill]]  ;;  %s2061_s25 = sld [smem:[#allocation32_spill]] }
 0x4d1   : > { %s2062_s17 = smov %s1556_s18  ;;  %25 = sbr.rel (!%p23_p5) target bundleno = 12 (0xc), region = 137 }
 0x4d2   : > { %s2063_s18 = smov %s2054_s20 }
 0x4d4   : > { %s2064_s20 = smov %s2056_s21  ;;  %s2065_s21 = smov %s2057_s23 }
 0x4d5   : > { %s2066_s23 = smov %s2059_s27 }
 0x4d8   :  { %950 = vsyncpa [#allocation8], 1 }
 0x4d9   :  { %952 = vsyncpa [#allocation8 + $0x1], 1 }
 0x4da   :  { %953 = vsyncpa [#allocation11], 1 }
 0x4db   :  { %954 = vsyncpa [#allocation9], 1 }
 0x4dc   :  { %956 = vsyncpa [#allocation9 + $0x1], 1 }
 0x4dd   :  { %957 = vsyncmov [#allocation6] }
 0x4e0   :  { %s958_s15 = vpop.sfrf %957 }
 0x4e1   :  { %p1143_p6 = scmp.ne.s32.totalorder %s958_s15, 0 }
 0x4e3   :  { %962 = shalt.err (%p1143_p6)  }

</bundles_post_ra>
